<compile_context>
chip_gen: v7x
topology: tpu7x:2x2x1
jax: 0.10.0
libtpu: 0.0.40
codegen_flags: <defaults>
</compile_context>

<pallas_src>
import jax
import jax.numpy as jnp
from jax.experimental import pallas as pl
from jax.experimental.pallas import tpu as pltpu

# Small model dims (consistent with an encoder forward)
B, S, D = 2, 8, 32          # batch, encoder_sequence_length, hidden
H = 4                       # attention heads
DH = D // H                 # head dim
FFN = 64                    # feed-forward dim
VOCAB = 100                 # vocabulary size
N_LAYERS = 2
EPS = 1e-5
NEG = -1e9
BS = B * S


def encoder_layer_kernel(bias_ref, x_ref,
                         wqkv_ref, bqkv_ref, wo_ref, bo_ref,
                         ln1_g_ref, ln1_b_ref,
                         w1_ref, b1_ref, w2_ref, b2_ref,
                         ln2_g_ref, ln2_b_ref,
                         out_ref, act_ref):
    """One encoder layer per grid step; activation carried in VMEM scratch.

    Shapes of the per-step views:
      bias_ref : (B, 1, S)     f32   additive attention bias (0 / -1e9), resident
      x_ref    : (BS, D)       f32   embedded tokens (flat rows), resident
      wqkv     : (1, D, 3D)    bf16  fused QKV weights (Wq pre-scaled by 1/sqrt(DH))
      bqkv     : (1, 1, 3D)    f32
      wo       : (1, D, D)     bf16
      w1       : (1, D, FFN)   bf16,  w2: (1, FFN, D) bf16
      bo/b1/b2/ln* : (1, 1, D|FFN) f32
      out_ref  : (BS, D)       f32   (same block every step -> resident)
      act_ref  : (BS, D)       f32   VMEM scratch, persists across grid steps
    """
    l = pl.program_id(0)

    @pl.when(l == 0)
    def _():
        act_ref[...] = x_ref[...]

    xf = act_ref[...]                                   # (BS, D) f32

    # ---- fused QKV projection: one bf16 matmul, f32 accumulate ----
    qkv = jnp.dot(xf.astype(jnp.bfloat16), wqkv_ref[0],
                  preferred_element_type=jnp.float32) + bqkv_ref[0]   # (BS, 3D)
    q = qkv[:, 0 * D:1 * D]                             # already scaled by 1/sqrt(DH)
    k = qkv[:, 1 * D:2 * D]
    v = qkv[:, 2 * D:3 * D]

    # ---- multi-head self-attention (static head/batch loops, tiny S) ----
    ctx_heads = []
    for h in range(H):
        cols = slice(h * DH, (h + 1) * DH)              # static lane slice, 1 vreg
        qh, kh, vh = q[:, cols], k[:, cols], v[:, cols]
        rows_ctx = []
        for b in range(B):
            rows = slice(b * S, (b + 1) * S)            # static sublane slice
            s = jax.lax.dot_general(                    # q . k^T without explicit T
                qh[rows], kh[rows],
                dimension_numbers=(((1,), (1,)), ((), ())),
                preferred_element_type=jnp.float32)     # (S, S)
            s = s + bias_ref[b]                         # mask padded keys
            s = s - jnp.max(s, axis=-1, keepdims=True)
            p = jnp.exp(s)
            p = p * pl.reciprocal(jnp.sum(p, axis=-1, keepdims=True), approx=False)
            rows_ctx.append(jnp.dot(p, vh[rows],
                                    preferred_element_type=jnp.float32))   # (S, DH)
        ctx_heads.append(jnp.concatenate(rows_ctx, axis=0))   # (BS, DH) sublane concat
    ctx = jnp.concatenate(ctx_heads, axis=-1)                 # (BS, D) lane concat

    # ---- output projection: single full-depth (D, D) matmul ----
    attn = jnp.dot(ctx.astype(jnp.bfloat16), wo_ref[0],
                   preferred_element_type=jnp.float32) + bo_ref[0]

    # ---- residual + layernorm 1 (f32 elementwise) ----
    h1 = xf + attn
    mu1 = jnp.mean(h1, axis=-1, keepdims=True)
    var1 = jnp.mean((h1 - mu1) ** 2, axis=-1, keepdims=True)
    h1n = (h1 - mu1) * jax.lax.rsqrt(var1 + EPS) * ln1_g_ref[0] + ln1_b_ref[0]

    # ---- feed-forward (bf16 matmuls, f32 accumulate / elementwise) ----
    f = jnp.dot(h1n.astype(jnp.bfloat16), w1_ref[0],
                preferred_element_type=jnp.float32) + b1_ref[0]
    f = jnp.maximum(f, 0.0)
    f = jnp.dot(f.astype(jnp.bfloat16), w2_ref[0],
                preferred_element_type=jnp.float32) + b2_ref[0]

    # ---- residual + layernorm 2 ----
    h2 = h1n + f
    mu2 = jnp.mean(h2, axis=-1, keepdims=True)
    var2 = jnp.mean((h2 - mu2) ** 2, axis=-1, keepdims=True)
    xnew = (h2 - mu2) * jax.lax.rsqrt(var2 + EPS) * ln2_g_ref[0] + ln2_b_ref[0]

    act_ref[...] = xnew                                  # carry to next layer
    out_ref[...] = xnew                                  # resident output block


def pack_layer_params(layers):
    """Stack per-layer params with a leading layer axis.

    Wq|Wk|Wv fused as (L, D, 3D); 1/sqrt(DH) folded into the Q columns; weight
    matrices cast to bf16 (matmul operands), biases / LN params kept f32.
    """
    scale = 1.0 / (DH ** 0.5)

    def qkv_w(lp):
        return jnp.concatenate([lp["wq"] * scale, lp["wk"], lp["wv"]], axis=-1)

    def qkv_b(lp):
        return jnp.concatenate([lp["bq"] * scale, lp["bk"], lp["bv"]], axis=-1)

    bf16 = lambda a: a.astype(jnp.bfloat16)
    return dict(
        wqkv=bf16(jnp.stack([qkv_w(lp) for lp in layers])),     # (L, D, 3D)
        bqkv=jnp.stack([qkv_b(lp) for lp in layers]),            # (L, 1, 3D)
        wo=bf16(jnp.stack([lp["wo"] for lp in layers])),         # (L, D, D)
        bo=jnp.stack([lp["bo"] for lp in layers]),
        ln1_g=jnp.stack([lp["ln1_g"] for lp in layers]),
        ln1_b=jnp.stack([lp["ln1_b"] for lp in layers]),
        w1=bf16(jnp.stack([lp["w1"] for lp in layers])),         # (L, D, FFN)
        b1=jnp.stack([lp["b1"] for lp in layers]),
        w2=bf16(jnp.stack([lp["w2"] for lp in layers])),         # (L, FFN, D)
        b2=jnp.stack([lp["b2"] for lp in layers]),
        ln2_g=jnp.stack([lp["ln2_g"] for lp in layers]),
        ln2_b=jnp.stack([lp["ln2_b"] for lp in layers]),
    )


def init_params(key):
    """Deterministic synthetic encoder parameters."""
    params = {}
    key, ek = jax.random.split(key)
    params["embedding"] = 0.02 * jax.random.normal(ek, (VOCAB, D), jnp.float32)
    layers = []
    for _ in range(N_LAYERS):
        lp = {}
        for name, shape in [("wq", (D, D)), ("wk", (D, D)), ("wv", (D, D)),
                            ("wo", (D, D)), ("w1", (D, FFN)), ("w2", (FFN, D))]:
            key, k2 = jax.random.split(key)
            lp[name] = 0.02 * jax.random.normal(k2, shape, jnp.float32)
        lp["bq"] = jnp.zeros((1, D), jnp.float32)
        lp["bk"] = jnp.zeros((1, D), jnp.float32)
        lp["bv"] = jnp.zeros((1, D), jnp.float32)
        lp["bo"] = jnp.zeros((1, D), jnp.float32)
        lp["b1"] = jnp.zeros((1, FFN), jnp.float32)
        lp["b2"] = jnp.zeros((1, D), jnp.float32)
        lp["ln1_g"] = jnp.ones((1, D), jnp.float32)
        lp["ln1_b"] = jnp.zeros((1, D), jnp.float32)
        lp["ln2_g"] = jnp.ones((1, D), jnp.float32)
        lp["ln2_b"] = jnp.zeros((1, D), jnp.float32)
        layers.append(lp)
    params["layers"] = layers
    params["packed"] = pack_layer_params(layers)
    return params


def inc_encoder_forward(input_ids, attention_mask, params):
    """Mirrors INCEncoder.forward: model(input_ids, attention_mask) -> last_hidden_state."""
    # Embedding lookup (gather) — glue in plain JAX; flat (BS, D) rows for the kernel.
    x = jnp.take(params["embedding"], input_ids, axis=0).reshape(BS, D)   # f32
    # Padding mask -> additive bias: 0 where attended, -1e9 where masked.
    attn_bias = ((1.0 - attention_mask.astype(jnp.float32)) * NEG)[:, None, :]  # (B,1,S)

    p = params["packed"]
    args = (attn_bias, x,
            p["wqkv"], p["bqkv"], p["wo"], p["bo"],
            p["ln1_g"], p["ln1_b"],
            p["w1"], p["b1"], p["w2"], p["b2"],
            p["ln2_g"], p["ln2_b"])

    def resident(shape):        # same block every layer step
        return pl.BlockSpec(shape, lambda l, n=len(shape): (0,) * n)

    def per_layer(shape):       # leading layer axis streamed by the grid
        return pl.BlockSpec((1,) + shape, lambda l, n=len(shape): (l,) + (0,) * n)

    in_specs = [
        resident((B, 1, S)),            # attn bias
        resident((BS, D)),              # embedded tokens
        per_layer((D, 3 * D)),          # wqkv
        per_layer((1, 3 * D)),          # bqkv
        per_layer((D, D)),              # wo
        per_layer((1, D)),              # bo
        per_layer((1, D)),              # ln1_g
        per_layer((1, D)),              # ln1_b
        per_layer((D, FFN)),            # w1
        per_layer((1, FFN)),            # b1
        per_layer((FFN, D)),            # w2
        per_layer((1, D)),              # b2
        per_layer((1, D)),              # ln2_g
        per_layer((1, D)),              # ln2_b
    ]
    out_spec = pl.BlockSpec((BS, D), lambda l: (0, 0))

    # Advisory cost estimate for XLA scheduling around the custom call.
    proj_flops = 2 * BS * D * (3 * D) + 2 * BS * D * D
    attn_flops = 2 * B * H * S * S * DH * 2
    ffn_flops = 2 * BS * D * FFN * 2
    flops = N_LAYERS * (proj_flops + attn_flops + ffn_flops)
    transcendentals = N_LAYERS * (B * H * S * S + 2 * BS)
    bytes_accessed = int(sum(a.size * a.dtype.itemsize for a in args) + BS * D * 4)

    out = pl.pallas_call(
        encoder_layer_kernel,
        out_shape=jax.ShapeDtypeStruct((BS, D), jnp.float32),
        grid_spec=pltpu.PrefetchScalarGridSpec(
            num_scalar_prefetch=0,
            grid=(N_LAYERS,),
            in_specs=in_specs,
            out_specs=out_spec,
            scratch_shapes=[pltpu.VMEM((BS, D), jnp.float32)]),
        compiler_params=pltpu.CompilerParams(
            dimension_semantics=("arbitrary",),
            vmem_limit_bytes=32 * 1024 * 1024),
        cost_estimate=pl.CostEstimate(flops=flops,
                                      transcendentals=transcendentals,
                                      bytes_accessed=bytes_accessed),
    )(*args)
    return out.reshape(B, S, D)


# ---------------- pure-JAX reference (matches kernel numerics) ----------------
def _layer_norm(h, g, b):
    mu = jnp.mean(h, axis=-1, keepdims=True)
    var = jnp.mean((h - mu) ** 2, axis=-1, keepdims=True)
    return (h - mu) * jax.lax.rsqrt(var + EPS) * g + b


def _bf16_dot(a, w):
    # Same mixed precision as the kernel's weight matmuls: bf16 operands, f32 acc.
    return jnp.dot(a.astype(jnp.bfloat16), w.astype(jnp.bfloat16),
                   preferred_element_type=jnp.float32)


def encoder_reference(input_ids, attention_mask, params):
    x = jnp.take(params["embedding"], input_ids, axis=0)                  # (B,S,D)
    bias = ((1.0 - attention_mask.astype(jnp.float32)) * NEG)[:, None, :]  # (B,1,S)
    for lp in params["layers"]:
        q = _bf16_dot(x, lp["wq"]) + lp["bq"]
        k = _bf16_dot(x, lp["wk"]) + lp["bk"]
        v = _bf16_dot(x, lp["wv"]) + lp["bv"]
        qh = q.reshape(B, S, H, DH).transpose(0, 2, 1, 3)
        kh = k.reshape(B, S, H, DH).transpose(0, 2, 1, 3)
        vh = v.reshape(B, S, H, DH).transpose(0, 2, 1, 3)
        s = jnp.einsum('bhqd,bhkd->bhqk', qh, kh) / (DH ** 0.5)
        s = s + bias[:, None, :, :]
        p = jax.nn.softmax(s, axis=-1)
        ctx = jnp.einsum('bhqk,bhkd->bhqd', p, vh).transpose(0, 2, 1, 3).reshape(B, S, D)
        attn = _bf16_dot(ctx, lp["wo"]) + lp["bo"]
        h1n = _layer_norm(x + attn, lp["ln1_g"], lp["ln1_b"])
        f = jnp.maximum(_bf16_dot(h1n, lp["w1"]) + lp["b1"], 0.0)
        f = _bf16_dot(f, lp["w2"]) + lp["b2"]
        x = _layer_norm(h1n + f, lp["ln2_g"], lp["ln2_b"])
    return x


if __name__ == "__main__":
    key = jax.random.PRNGKey(0)
    key, pk, ik = jax.random.split(key, 3)
    params = init_params(pk)

    # input_ids: (B, S) int32 token indices; attention_mask: (B, S) {0,1}
    input_ids = jax.random.randint(ik, (B, S), 0, VOCAB, dtype=jnp.int32)
    attention_mask = jnp.ones((B, S), dtype=jnp.int32)
    attention_mask = attention_mask.at[1, S - 2:].set(0)   # pad last 2 tokens of batch 1

    last_hidden_state = jax.jit(inc_encoder_forward)(input_ids, attention_mask, params)
    jax.block_until_ready(last_hidden_state)

    assert last_hidden_state.shape == (B, S, D)
    assert last_hidden_state.dtype == jnp.float32
    assert bool(jnp.all(jnp.isfinite(last_hidden_state)))

    # Numerical check vs. a reference using the same bf16-operand matmul precision
    # (kernel folds 1/sqrt(DH) into Wq and fuses QKV; both are mathematically identical).
    ref = encoder_reference(input_ids, attention_mask, params)
    assert bool(jnp.allclose(last_hidden_state, ref, rtol=2e-2, atol=2e-2))

    print("KERNEL_OK")
</pallas_src>

<mosaic_0001>
module attributes {stable_mosaic.version = 11 : i64} {
  func.func @encoder_layer_kernel(%arg0: i32, %arg1: memref<2x1x8xf32, #tpu.memory_space<vmem>>, %arg2: memref<16x32xf32, #tpu.memory_space<vmem>>, %arg3: memref<1x32x96xbf16, #tpu.memory_space<vmem>>, %arg4: memref<1x1x96xf32, #tpu.memory_space<vmem>>, %arg5: memref<1x32x32xbf16, #tpu.memory_space<vmem>>, %arg6: memref<1x1x32xf32, #tpu.memory_space<vmem>>, %arg7: memref<1x1x32xf32, #tpu.memory_space<vmem>>, %arg8: memref<1x1x32xf32, #tpu.memory_space<vmem>>, %arg9: memref<1x32x64xbf16, #tpu.memory_space<vmem>>, %arg10: memref<1x1x64xf32, #tpu.memory_space<vmem>>, %arg11: memref<1x64x32xbf16, #tpu.memory_space<vmem>>, %arg12: memref<1x1x32xf32, #tpu.memory_space<vmem>>, %arg13: memref<1x1x32xf32, #tpu.memory_space<vmem>>, %arg14: memref<1x1x32xf32, #tpu.memory_space<vmem>>, %arg15: memref<16x32xf32, #tpu.memory_space<vmem>>, %arg16: memref<16x32xf32, #tpu.memory_space<vmem>>) attributes {dimension_semantics = [#tpu.dimension_semantics<arbitrary>], iteration_bounds = array<i64: 2>, scalar_prefetch = 0 : i64, scratch_operands = 1 : i64, tpu.core_type = #tpu.core_type<tc>, window_params = [{pipeline_mode = #tpu.pipeline_mode<synchronous>, transform_indices = @transform_0, window_bounds = array<i64: 2, 1, 8>}, {pipeline_mode = #tpu.pipeline_mode<synchronous>, transform_indices = @transform_1, window_bounds = array<i64: 16, 32>}, {transform_indices = @transform_2, window_bounds = array<i64: 1, 32, 96>}, {transform_indices = @transform_3, window_bounds = array<i64: 1, 1, 96>}, {transform_indices = @transform_4, window_bounds = array<i64: 1, 32, 32>}, {transform_indices = @transform_5, window_bounds = array<i64: 1, 1, 32>}, {transform_indices = @transform_6, window_bounds = array<i64: 1, 1, 32>}, {transform_indices = @transform_7, window_bounds = array<i64: 1, 1, 32>}, {transform_indices = @transform_8, window_bounds = array<i64: 1, 32, 64>}, {transform_indices = @transform_9, window_bounds = array<i64: 1, 1, 64>}, {transform_indices = @transform_10, window_bounds = array<i64: 1, 64, 32>}, {transform_indices = @transform_11, window_bounds = array<i64: 1, 1, 32>}, {transform_indices = @transform_12, window_bounds = array<i64: 1, 1, 32>}, {transform_indices = @transform_13, window_bounds = array<i64: 1, 1, 32>}, {pipeline_mode = #tpu.pipeline_mode<synchronous>, transform_indices = @transform_14, window_bounds = array<i64: 16, 32>}]} {
    %c0_i32 = arith.constant 0 : i32
    %0 = arith.cmpi eq, %arg0, %c0_i32 : i32
    %1 = arith.extui %0 : i1 to i32
    %c0_i32_0 = arith.constant 0 : i32
    %2 = arith.cmpi ne, %1, %c0_i32_0 : i32
    scf.if %2 {
      %c0_111 = arith.constant 0 : index
      %c0_112 = arith.constant 0 : index
      %266 = vector.load %arg2[%c0_111, %c0_112] : memref<16x32xf32, #tpu.memory_space<vmem>>, vector<16x32xf32>
      %c0_113 = arith.constant 0 : index
      %c0_114 = arith.constant 0 : index
      %267 = vector.load %arg16[%c0_113, %c0_114] : memref<16x32xf32, #tpu.memory_space<vmem>>, vector<16x32xf32>
      tpu.vector_store %arg16[%c0_113, %c0_114], %266 {strides = array<i32>} : memref<16x32xf32, #tpu.memory_space<vmem>>, vector<16x32xf32>,
    } else {
    }
    %c0 = arith.constant 0 : index
    %c0_1 = arith.constant 0 : index
    %3 = vector.load %arg16[%c0, %c0_1] : memref<16x32xf32, #tpu.memory_space<vmem>>, vector<16x32xf32>
    %4 = arith.truncf %3 : vector<16x32xf32> to vector<16x32xbf16>
    %c0_2 = arith.constant 0 : index
    %c0_3 = arith.constant 0 : index
    %c0_4 = arith.constant 0 : index
    %5 = vector.load %arg3[%c0_2, %c0_3, %c0_4] : memref<1x32x96xbf16, #tpu.memory_space<vmem>>, vector<1x32x96xbf16>
    %6 = vector.shape_cast %5 : vector<1x32x96xbf16> to vector<32x96xbf16>
    %cst = arith.constant dense<0.000000e+00> : vector<16x96xf32>
    %7 = tpu.matmul %4, %6, %cst {dimension_numbers = #tpu.dot_dimension_numbers<[1], [0], [0], [1], [0, 0, 1, 1], [], []>} : vector<16x32xbf16>, vector<32x96xbf16>, vector<16x96xf32> -> vector<16x96xf32>
    %c0_5 = arith.constant 0 : index
    %c0_6 = arith.constant 0 : index
    %c0_7 = arith.constant 0 : index
    %8 = vector.load %arg4[%c0_5, %c0_6, %c0_7] : memref<1x1x96xf32, #tpu.memory_space<vmem>>, vector<1x1x96xf32>
    %9 = vector.shape_cast %8 : vector<1x1x96xf32> to vector<1x96xf32>
    %10 = vector.broadcast %9 : vector<1x96xf32> to vector<16x96xf32>
    %11 = arith.addf %7, %10 : vector<16x96xf32>
    %12 = vector.extract_strided_slice %11 {offsets = [0, 0], sizes = [16, 32], strides = [1, 1]} : vector<16x96xf32> to vector<16x32xf32>
    %13 = vector.extract_strided_slice %11 {offsets = [0, 32], sizes = [16, 32], strides = [1, 1]} : vector<16x96xf32> to vector<16x32xf32>
    %14 = vector.extract_strided_slice %11 {offsets = [0, 64], sizes = [16, 32], strides = [1, 1]} : vector<16x96xf32> to vector<16x32xf32>
    %15 = vector.extract_strided_slice %12 {offsets = [0, 0], sizes = [16, 8], strides = [1, 1]} : vector<16x32xf32> to vector<16x8xf32>
    %16 = vector.extract_strided_slice %13 {offsets = [0, 0], sizes = [16, 8], strides = [1, 1]} : vector<16x32xf32> to vector<16x8xf32>
    %17 = vector.extract_strided_slice %14 {offsets = [0, 0], sizes = [16, 8], strides = [1, 1]} : vector<16x32xf32> to vector<16x8xf32>
    %18 = vector.extract_strided_slice %15 {offsets = [0, 0], sizes = [8, 8], strides = [1, 1]} : vector<16x8xf32> to vector<8x8xf32>
    %19 = vector.extract_strided_slice %16 {offsets = [0, 0], sizes = [8, 8], strides = [1, 1]} : vector<16x8xf32> to vector<8x8xf32>
    %cst_8 = arith.constant dense<0.000000e+00> : vector<8x8xf32>
    %20 = tpu.matmul %18, %19, %cst_8 {dimension_numbers = #tpu.dot_dimension_numbers<[1], [1], [0], [0], [0, 0, 1, 0], [], []>} : vector<8x8xf32>, vector<8x8xf32>, vector<8x8xf32> -> vector<8x8xf32>
    %c0_9 = arith.constant 0 : index
    %c0_10 = arith.constant 0 : index
    %c0_11 = arith.constant 0 : index
    %21 = vector.load %arg1[%c0_9, %c0_10, %c0_11] : memref<2x1x8xf32, #tpu.memory_space<vmem>>, vector<1x1x8xf32>
    %22 = vector.shape_cast %21 : vector<1x1x8xf32> to vector<1x8xf32>
    %23 = vector.broadcast %22 : vector<1x8xf32> to vector<8x8xf32>
    %24 = arith.addf %20, %23 : vector<8x8xf32>
    %cst_12 = arith.constant dense<0xFF800000> : vector<8xf32>
    %25 = vector.multi_reduction <maximumf>, %24, %cst_12 [1] : vector<8x8xf32> to vector<8xf32>
    %26 = vector.shape_cast %25 : vector<8xf32> to vector<8x1xf32>
    %27 = vector.broadcast %26 : vector<8x1xf32> to vector<8x8xf32>
    %28 = arith.subf %24, %27 : vector<8x8xf32>
    %29 = math.exp %28 : vector<8x8xf32>
    %cst_13 = arith.constant dense<0.000000e+00> : vector<8xf32>
    %30 = vector.multi_reduction <add>, %29, %cst_13 [1] : vector<8x8xf32> to vector<8xf32>
    %31 = vector.shape_cast %30 : vector<8xf32> to vector<8x1xf32>
    %32 = tpu.reciprocal %31 : vector<8x1xf32> -> vector<8x1xf32>
    %33 = vector.broadcast %32 : vector<8x1xf32> to vector<8x8xf32>
    %34 = arith.mulf %29, %33 : vector<8x8xf32>
    %35 = vector.extract_strided_slice %17 {offsets = [0, 0], sizes = [8, 8], strides = [1, 1]} : vector<16x8xf32> to vector<8x8xf32>
    %cst_14 = arith.constant dense<0.000000e+00> : vector<8x8xf32>
    %36 = tpu.matmul %34, %35, %cst_14 {dimension_numbers = #tpu.dot_dimension_numbers<[1], [0], [0], [1], [0, 0, 1, 1], [], []>} : vector<8x8xf32>, vector<8x8xf32>, vector<8x8xf32> -> vector<8x8xf32>
    %37 = vector.extract_strided_slice %15 {offsets = [8, 0], sizes = [8, 8], strides = [1, 1]} : vector<16x8xf32> to vector<8x8xf32>
    %38 = vector.extract_strided_slice %16 {offsets = [8, 0], sizes = [8, 8], strides = [1, 1]} : vector<16x8xf32> to vector<8x8xf32>
    %cst_15 = arith.constant dense<0.000000e+00> : vector<8x8xf32>
    %39 = tpu.matmul %37, %38, %cst_15 {dimension_numbers = #tpu.dot_dimension_numbers<[1], [1], [0], [0], [0, 0, 1, 0], [], []>} : vector<8x8xf32>, vector<8x8xf32>, vector<8x8xf32> -> vector<8x8xf32>
    %c1 = arith.constant 1 : index
    %c0_16 = arith.constant 0 : index
    %c0_17 = arith.constant 0 : index
    %40 = vector.load %arg1[%c1, %c0_16, %c0_17] : memref<2x1x8xf32, #tpu.memory_space<vmem>>, vector<1x1x8xf32>
    %41 = vector.shape_cast %40 : vector<1x1x8xf32> to vector<1x8xf32>
    %42 = vector.broadcast %41 : vector<1x8xf32> to vector<8x8xf32>
    %43 = arith.addf %39, %42 : vector<8x8xf32>
    %cst_18 = arith.constant dense<0xFF800000> : vector<8xf32>
    %44 = vector.multi_reduction <maximumf>, %43, %cst_18 [1] : vector<8x8xf32> to vector<8xf32>
    %45 = vector.shape_cast %44 : vector<8xf32> to vector<8x1xf32>
    %46 = vector.broadcast %45 : vector<8x1xf32> to vector<8x8xf32>
    %47 = arith.subf %43, %46 : vector<8x8xf32>
    %48 = math.exp %47 : vector<8x8xf32>
    %cst_19 = arith.constant dense<0.000000e+00> : vector<8xf32>
    %49 = vector.multi_reduction <add>, %48, %cst_19 [1] : vector<8x8xf32> to vector<8xf32>
    %50 = vector.shape_cast %49 : vector<8xf32> to vector<8x1xf32>
    %51 = tpu.reciprocal %50 : vector<8x1xf32> -> vector<8x1xf32>
    %52 = vector.broadcast %51 : vector<8x1xf32> to vector<8x8xf32>
    %53 = arith.mulf %48, %52 : vector<8x8xf32>
    %54 = vector.extract_strided_slice %17 {offsets = [8, 0], sizes = [8, 8], strides = [1, 1]} : vector<16x8xf32> to vector<8x8xf32>
    %cst_20 = arith.constant dense<0.000000e+00> : vector<8x8xf32>
    %55 = tpu.matmul %53, %54, %cst_20 {dimension_numbers = #tpu.dot_dimension_numbers<[1], [0], [0], [1], [0, 0, 1, 1], [], []>} : vector<8x8xf32>, vector<8x8xf32>, vector<8x8xf32> -> vector<8x8xf32>
    %56 = tpu.concatenate %36, %55 in 0 : vector<8x8xf32>, vector<8x8xf32> -> vector<16x8xf32>
    %57 = vector.extract_strided_slice %12 {offsets = [0, 8], sizes = [16, 8], strides = [1, 1]} : vector<16x32xf32> to vector<16x8xf32>
    %58 = vector.extract_strided_slice %13 {offsets = [0, 8], sizes = [16, 8], strides = [1, 1]} : vector<16x32xf32> to vector<16x8xf32>
    %59 = vector.extract_strided_slice %14 {offsets = [0, 8], sizes = [16, 8], strides = [1, 1]} : vector<16x32xf32> to vector<16x8xf32>
    %60 = vector.extract_strided_slice %57 {offsets = [0, 0], sizes = [8, 8], strides = [1, 1]} : vector<16x8xf32> to vector<8x8xf32>
    %61 = vector.extract_strided_slice %58 {offsets = [0, 0], sizes = [8, 8], strides = [1, 1]} : vector<16x8xf32> to vector<8x8xf32>
    %cst_21 = arith.constant dense<0.000000e+00> : vector<8x8xf32>
    %62 = tpu.matmul %60, %61, %cst_21 {dimension_numbers = #tpu.dot_dimension_numbers<[1], [1], [0], [0], [0, 0, 1, 0], [], []>} : vector<8x8xf32>, vector<8x8xf32>, vector<8x8xf32> -> vector<8x8xf32>
    %c0_22 = arith.constant 0 : index
    %c0_23 = arith.constant 0 : index
    %c0_24 = arith.constant 0 : index
    %63 = vector.load %arg1[%c0_22, %c0_23, %c0_24] : memref<2x1x8xf32, #tpu.memory_space<vmem>>, vector<1x1x8xf32>
    %64 = vector.shape_cast %63 : vector<1x1x8xf32> to vector<1x8xf32>
    %65 = vector.broadcast %64 : vector<1x8xf32> to vector<8x8xf32>
    %66 = arith.addf %62, %65 : vector<8x8xf32>
    %cst_25 = arith.constant dense<0xFF800000> : vector<8xf32>
    %67 = vector.multi_reduction <maximumf>, %66, %cst_25 [1] : vector<8x8xf32> to vector<8xf32>
    %68 = vector.shape_cast %67 : vector<8xf32> to vector<8x1xf32>
    %69 = vector.broadcast %68 : vector<8x1xf32> to vector<8x8xf32>
    %70 = arith.subf %66, %69 : vector<8x8xf32>
    %71 = math.exp %70 : vector<8x8xf32>
    %cst_26 = arith.constant dense<0.000000e+00> : vector<8xf32>
    %72 = vector.multi_reduction <add>, %71, %cst_26 [1] : vector<8x8xf32> to vector<8xf32>
    %73 = vector.shape_cast %72 : vector<8xf32> to vector<8x1xf32>
    %74 = tpu.reciprocal %73 : vector<8x1xf32> -> vector<8x1xf32>
    %75 = vector.broadcast %74 : vector<8x1xf32> to vector<8x8xf32>
    %76 = arith.mulf %71, %75 : vector<8x8xf32>
    %77 = vector.extract_strided_slice %59 {offsets = [0, 0], sizes = [8, 8], strides = [1, 1]} : vector<16x8xf32> to vector<8x8xf32>
    %cst_27 = arith.constant dense<0.000000e+00> : vector<8x8xf32>
    %78 = tpu.matmul %76, %77, %cst_27 {dimension_numbers = #tpu.dot_dimension_numbers<[1], [0], [0], [1], [0, 0, 1, 1], [], []>} : vector<8x8xf32>, vector<8x8xf32>, vector<8x8xf32> -> vector<8x8xf32>
    %79 = vector.extract_strided_slice %57 {offsets = [8, 0], sizes = [8, 8], strides = [1, 1]} : vector<16x8xf32> to vector<8x8xf32>
    %80 = vector.extract_strided_slice %58 {offsets = [8, 0], sizes = [8, 8], strides = [1, 1]} : vector<16x8xf32> to vector<8x8xf32>
    %cst_28 = arith.constant dense<0.000000e+00> : vector<8x8xf32>
    %81 = tpu.matmul %79, %80, %cst_28 {dimension_numbers = #tpu.dot_dimension_numbers<[1], [1], [0], [0], [0, 0, 1, 0], [], []>} : vector<8x8xf32>, vector<8x8xf32>, vector<8x8xf32> -> vector<8x8xf32>
    %c1_29 = arith.constant 1 : index
    %c0_30 = arith.constant 0 : index
    %c0_31 = arith.constant 0 : index
    %82 = vector.load %arg1[%c1_29, %c0_30, %c0_31] : memref<2x1x8xf32, #tpu.memory_space<vmem>>, vector<1x1x8xf32>
    %83 = vector.shape_cast %82 : vector<1x1x8xf32> to vector<1x8xf32>
    %84 = vector.broadcast %83 : vector<1x8xf32> to vector<8x8xf32>
    %85 = arith.addf %81, %84 : vector<8x8xf32>
    %cst_32 = arith.constant dense<0xFF800000> : vector<8xf32>
    %86 = vector.multi_reduction <maximumf>, %85, %cst_32 [1] : vector<8x8xf32> to vector<8xf32>
    %87 = vector.shape_cast %86 : vector<8xf32> to vector<8x1xf32>
    %88 = vector.broadcast %87 : vector<8x1xf32> to vector<8x8xf32>
    %89 = arith.subf %85, %88 : vector<8x8xf32>
    %90 = math.exp %89 : vector<8x8xf32>
    %cst_33 = arith.constant dense<0.000000e+00> : vector<8xf32>
    %91 = vector.multi_reduction <add>, %90, %cst_33 [1] : vector<8x8xf32> to vector<8xf32>
    %92 = vector.shape_cast %91 : vector<8xf32> to vector<8x1xf32>
    %93 = tpu.reciprocal %92 : vector<8x1xf32> -> vector<8x1xf32>
    %94 = vector.broadcast %93 : vector<8x1xf32> to vector<8x8xf32>
    %95 = arith.mulf %90, %94 : vector<8x8xf32>
    %96 = vector.extract_strided_slice %59 {offsets = [8, 0], sizes = [8, 8], strides = [1, 1]} : vector<16x8xf32> to vector<8x8xf32>
    %cst_34 = arith.constant dense<0.000000e+00> : vector<8x8xf32>
    %97 = tpu.matmul %95, %96, %cst_34 {dimension_numbers = #tpu.dot_dimension_numbers<[1], [0], [0], [1], [0, 0, 1, 1], [], []>} : vector<8x8xf32>, vector<8x8xf32>, vector<8x8xf32> -> vector<8x8xf32>
    %98 = tpu.concatenate %78, %97 in 0 : vector<8x8xf32>, vector<8x8xf32> -> vector<16x8xf32>
    %99 = vector.extract_strided_slice %12 {offsets = [0, 16], sizes = [16, 8], strides = [1, 1]} : vector<16x32xf32> to vector<16x8xf32>
    %100 = vector.extract_strided_slice %13 {offsets = [0, 16], sizes = [16, 8], strides = [1, 1]} : vector<16x32xf32> to vector<16x8xf32>
    %101 = vector.extract_strided_slice %14 {offsets = [0, 16], sizes = [16, 8], strides = [1, 1]} : vector<16x32xf32> to vector<16x8xf32>
    %102 = vector.extract_strided_slice %99 {offsets = [0, 0], sizes = [8, 8], strides = [1, 1]} : vector<16x8xf32> to vector<8x8xf32>
    %103 = vector.extract_strided_slice %100 {offsets = [0, 0], sizes = [8, 8], strides = [1, 1]} : vector<16x8xf32> to vector<8x8xf32>
    %cst_35 = arith.constant dense<0.000000e+00> : vector<8x8xf32>
    %104 = tpu.matmul %102, %103, %cst_35 {dimension_numbers = #tpu.dot_dimension_numbers<[1], [1], [0], [0], [0, 0, 1, 0], [], []>} : vector<8x8xf32>, vector<8x8xf32>, vector<8x8xf32> -> vector<8x8xf32>
    %c0_36 = arith.constant 0 : index
    %c0_37 = arith.constant 0 : index
    %c0_38 = arith.constant 0 : index
    %105 = vector.load %arg1[%c0_36, %c0_37, %c0_38] : memref<2x1x8xf32, #tpu.memory_space<vmem>>, vector<1x1x8xf32>
    %106 = vector.shape_cast %105 : vector<1x1x8xf32> to vector<1x8xf32>
    %107 = vector.broadcast %106 : vector<1x8xf32> to vector<8x8xf32>
    %108 = arith.addf %104, %107 : vector<8x8xf32>
    %cst_39 = arith.constant dense<0xFF800000> : vector<8xf32>
    %109 = vector.multi_reduction <maximumf>, %108, %cst_39 [1] : vector<8x8xf32> to vector<8xf32>
    %110 = vector.shape_cast %109 : vector<8xf32> to vector<8x1xf32>
    %111 = vector.broadcast %110 : vector<8x1xf32> to vector<8x8xf32>
    %112 = arith.subf %108, %111 : vector<8x8xf32>
    %113 = math.exp %112 : vector<8x8xf32>
    %cst_40 = arith.constant dense<0.000000e+00> : vector<8xf32>
    %114 = vector.multi_reduction <add>, %113, %cst_40 [1] : vector<8x8xf32> to vector<8xf32>
    %115 = vector.shape_cast %114 : vector<8xf32> to vector<8x1xf32>
    %116 = tpu.reciprocal %115 : vector<8x1xf32> -> vector<8x1xf32>
    %117 = vector.broadcast %116 : vector<8x1xf32> to vector<8x8xf32>
    %118 = arith.mulf %113, %117 : vector<8x8xf32>
    %119 = vector.extract_strided_slice %101 {offsets = [0, 0], sizes = [8, 8], strides = [1, 1]} : vector<16x8xf32> to vector<8x8xf32>
    %cst_41 = arith.constant dense<0.000000e+00> : vector<8x8xf32>
    %120 = tpu.matmul %118, %119, %cst_41 {dimension_numbers = #tpu.dot_dimension_numbers<[1], [0], [0], [1], [0, 0, 1, 1], [], []>} : vector<8x8xf32>, vector<8x8xf32>, vector<8x8xf32> -> vector<8x8xf32>
    %121 = vector.extract_strided_slice %99 {offsets = [8, 0], sizes = [8, 8], strides = [1, 1]} : vector<16x8xf32> to vector<8x8xf32>
    %122 = vector.extract_strided_slice %100 {offsets = [8, 0], sizes = [8, 8], strides = [1, 1]} : vector<16x8xf32> to vector<8x8xf32>
    %cst_42 = arith.constant dense<0.000000e+00> : vector<8x8xf32>
    %123 = tpu.matmul %121, %122, %cst_42 {dimension_numbers = #tpu.dot_dimension_numbers<[1], [1], [0], [0], [0, 0, 1, 0], [], []>} : vector<8x8xf32>, vector<8x8xf32>, vector<8x8xf32> -> vector<8x8xf32>
    %c1_43 = arith.constant 1 : index
    %c0_44 = arith.constant 0 : index
    %c0_45 = arith.constant 0 : index
    %124 = vector.load %arg1[%c1_43, %c0_44, %c0_45] : memref<2x1x8xf32, #tpu.memory_space<vmem>>, vector<1x1x8xf32>
    %125 = vector.shape_cast %124 : vector<1x1x8xf32> to vector<1x8xf32>
    %126 = vector.broadcast %125 : vector<1x8xf32> to vector<8x8xf32>
    %127 = arith.addf %123, %126 : vector<8x8xf32>
    %cst_46 = arith.constant dense<0xFF800000> : vector<8xf32>
    %128 = vector.multi_reduction <maximumf>, %127, %cst_46 [1] : vector<8x8xf32> to vector<8xf32>
    %129 = vector.shape_cast %128 : vector<8xf32> to vector<8x1xf32>
    %130 = vector.broadcast %129 : vector<8x1xf32> to vector<8x8xf32>
    %131 = arith.subf %127, %130 : vector<8x8xf32>
    %132 = math.exp %131 : vector<8x8xf32>
    %cst_47 = arith.constant dense<0.000000e+00> : vector<8xf32>
    %133 = vector.multi_reduction <add>, %132, %cst_47 [1] : vector<8x8xf32> to vector<8xf32>
    %134 = vector.shape_cast %133 : vector<8xf32> to vector<8x1xf32>
    %135 = tpu.reciprocal %134 : vector<8x1xf32> -> vector<8x1xf32>
    %136 = vector.broadcast %135 : vector<8x1xf32> to vector<8x8xf32>
    %137 = arith.mulf %132, %136 : vector<8x8xf32>
    %138 = vector.extract_strided_slice %101 {offsets = [8, 0], sizes = [8, 8], strides = [1, 1]} : vector<16x8xf32> to vector<8x8xf32>
    %cst_48 = arith.constant dense<0.000000e+00> : vector<8x8xf32>
    %139 = tpu.matmul %137, %138, %cst_48 {dimension_numbers = #tpu.dot_dimension_numbers<[1], [0], [0], [1], [0, 0, 1, 1], [], []>} : vector<8x8xf32>, vector<8x8xf32>, vector<8x8xf32> -> vector<8x8xf32>
    %140 = tpu.concatenate %120, %139 in 0 : vector<8x8xf32>, vector<8x8xf32> -> vector<16x8xf32>
    %141 = vector.extract_strided_slice %12 {offsets = [0, 24], sizes = [16, 8], strides = [1, 1]} : vector<16x32xf32> to vector<16x8xf32>
    %142 = vector.extract_strided_slice %13 {offsets = [0, 24], sizes = [16, 8], strides = [1, 1]} : vector<16x32xf32> to vector<16x8xf32>
    %143 = vector.extract_strided_slice %14 {offsets = [0, 24], sizes = [16, 8], strides = [1, 1]} : vector<16x32xf32> to vector<16x8xf32>
    %144 = vector.extract_strided_slice %141 {offsets = [0, 0], sizes = [8, 8], strides = [1, 1]} : vector<16x8xf32> to vector<8x8xf32>
    %145 = vector.extract_strided_slice %142 {offsets = [0, 0], sizes = [8, 8], strides = [1, 1]} : vector<16x8xf32> to vector<8x8xf32>
    %cst_49 = arith.constant dense<0.000000e+00> : vector<8x8xf32>
    %146 = tpu.matmul %144, %145, %cst_49 {dimension_numbers = #tpu.dot_dimension_numbers<[1], [1], [0], [0], [0, 0, 1, 0], [], []>} : vector<8x8xf32>, vector<8x8xf32>, vector<8x8xf32> -> vector<8x8xf32>
    %c0_50 = arith.constant 0 : index
    %c0_51 = arith.constant 0 : index
    %c0_52 = arith.constant 0 : index
    %147 = vector.load %arg1[%c0_50, %c0_51, %c0_52] : memref<2x1x8xf32, #tpu.memory_space<vmem>>, vector<1x1x8xf32>
    %148 = vector.shape_cast %147 : vector<1x1x8xf32> to vector<1x8xf32>
    %149 = vector.broadcast %148 : vector<1x8xf32> to vector<8x8xf32>
    %150 = arith.addf %146, %149 : vector<8x8xf32>
    %cst_53 = arith.constant dense<0xFF800000> : vector<8xf32>
    %151 = vector.multi_reduction <maximumf>, %150, %cst_53 [1] : vector<8x8xf32> to vector<8xf32>
    %152 = vector.shape_cast %151 : vector<8xf32> to vector<8x1xf32>
    %153 = vector.broadcast %152 : vector<8x1xf32> to vector<8x8xf32>
    %154 = arith.subf %150, %153 : vector<8x8xf32>
    %155 = math.exp %154 : vector<8x8xf32>
    %cst_54 = arith.constant dense<0.000000e+00> : vector<8xf32>
    %156 = vector.multi_reduction <add>, %155, %cst_54 [1] : vector<8x8xf32> to vector<8xf32>
    %157 = vector.shape_cast %156 : vector<8xf32> to vector<8x1xf32>
    %158 = tpu.reciprocal %157 : vector<8x1xf32> -> vector<8x1xf32>
    %159 = vector.broadcast %158 : vector<8x1xf32> to vector<8x8xf32>
    %160 = arith.mulf %155, %159 : vector<8x8xf32>
    %161 = vector.extract_strided_slice %143 {offsets = [0, 0], sizes = [8, 8], strides = [1, 1]} : vector<16x8xf32> to vector<8x8xf32>
    %cst_55 = arith.constant dense<0.000000e+00> : vector<8x8xf32>
    %162 = tpu.matmul %160, %161, %cst_55 {dimension_numbers = #tpu.dot_dimension_numbers<[1], [0], [0], [1], [0, 0, 1, 1], [], []>} : vector<8x8xf32>, vector<8x8xf32>, vector<8x8xf32> -> vector<8x8xf32>
    %163 = vector.extract_strided_slice %141 {offsets = [8, 0], sizes = [8, 8], strides = [1, 1]} : vector<16x8xf32> to vector<8x8xf32>
    %164 = vector.extract_strided_slice %142 {offsets = [8, 0], sizes = [8, 8], strides = [1, 1]} : vector<16x8xf32> to vector<8x8xf32>
    %cst_56 = arith.constant dense<0.000000e+00> : vector<8x8xf32>
    %165 = tpu.matmul %163, %164, %cst_56 {dimension_numbers = #tpu.dot_dimension_numbers<[1], [1], [0], [0], [0, 0, 1, 0], [], []>} : vector<8x8xf32>, vector<8x8xf32>, vector<8x8xf32> -> vector<8x8xf32>
    %c1_57 = arith.constant 1 : index
    %c0_58 = arith.constant 0 : index
    %c0_59 = arith.constant 0 : index
    %166 = vector.load %arg1[%c1_57, %c0_58, %c0_59] : memref<2x1x8xf32, #tpu.memory_space<vmem>>, vector<1x1x8xf32>
    %167 = vector.shape_cast %166 : vector<1x1x8xf32> to vector<1x8xf32>
    %168 = vector.broadcast %167 : vector<1x8xf32> to vector<8x8xf32>
    %169 = arith.addf %165, %168 : vector<8x8xf32>
    %cst_60 = arith.constant dense<0xFF800000> : vector<8xf32>
    %170 = vector.multi_reduction <maximumf>, %169, %cst_60 [1] : vector<8x8xf32> to vector<8xf32>
    %171 = vector.shape_cast %170 : vector<8xf32> to vector<8x1xf32>
    %172 = vector.broadcast %171 : vector<8x1xf32> to vector<8x8xf32>
    %173 = arith.subf %169, %172 : vector<8x8xf32>
    %174 = math.exp %173 : vector<8x8xf32>
    %cst_61 = arith.constant dense<0.000000e+00> : vector<8xf32>
    %175 = vector.multi_reduction <add>, %174, %cst_61 [1] : vector<8x8xf32> to vector<8xf32>
    %176 = vector.shape_cast %175 : vector<8xf32> to vector<8x1xf32>
    %177 = tpu.reciprocal %176 : vector<8x1xf32> -> vector<8x1xf32>
    %178 = vector.broadcast %177 : vector<8x1xf32> to vector<8x8xf32>
    %179 = arith.mulf %174, %178 : vector<8x8xf32>
    %180 = vector.extract_strided_slice %143 {offsets = [8, 0], sizes = [8, 8], strides = [1, 1]} : vector<16x8xf32> to vector<8x8xf32>
    %cst_62 = arith.constant dense<0.000000e+00> : vector<8x8xf32>
    %181 = tpu.matmul %179, %180, %cst_62 {dimension_numbers = #tpu.dot_dimension_numbers<[1], [0], [0], [1], [0, 0, 1, 1], [], []>} : vector<8x8xf32>, vector<8x8xf32>, vector<8x8xf32> -> vector<8x8xf32>
    %182 = tpu.concatenate %162, %181 in 0 : vector<8x8xf32>, vector<8x8xf32> -> vector<16x8xf32>
    %183 = tpu.concatenate %56, %98, %140, %182 in 1 : vector<16x8xf32>, vector<16x8xf32>, vector<16x8xf32>, vector<16x8xf32> -> vector<16x32xf32>
    %184 = arith.truncf %183 : vector<16x32xf32> to vector<16x32xbf16>
    %c0_63 = arith.constant 0 : index
    %c0_64 = arith.constant 0 : index
    %c0_65 = arith.constant 0 : index
    %185 = vector.load %arg5[%c0_63, %c0_64, %c0_65] : memref<1x32x32xbf16, #tpu.memory_space<vmem>>, vector<1x32x32xbf16>
    %186 = vector.shape_cast %185 : vector<1x32x32xbf16> to vector<32x32xbf16>
    %cst_66 = arith.constant dense<0.000000e+00> : vector<16x32xf32>
    %187 = tpu.matmul %184, %186, %cst_66 {dimension_numbers = #tpu.dot_dimension_numbers<[1], [0], [0], [1], [0, 0, 1, 1], [], []>} : vector<16x32xbf16>, vector<32x32xbf16>, vector<16x32xf32> -> vector<16x32xf32>
    %c0_67 = arith.constant 0 : index
    %c0_68 = arith.constant 0 : index
    %c0_69 = arith.constant 0 : index
    %188 = vector.load %arg6[%c0_67, %c0_68, %c0_69] : memref<1x1x32xf32, #tpu.memory_space<vmem>>, vector<1x1x32xf32>
    %189 = vector.shape_cast %188 : vector<1x1x32xf32> to vector<1x32xf32>
    %190 = vector.broadcast %189 : vector<1x32xf32> to vector<16x32xf32>
    %191 = arith.addf %187, %190 : vector<16x32xf32>
    %192 = arith.addf %3, %191 : vector<16x32xf32>
    %cst_70 = arith.constant dense<0.000000e+00> : vector<16xf32>
    %193 = vector.multi_reduction <add>, %192, %cst_70 [1] : vector<16x32xf32> to vector<16xf32>
    %194 = vector.shape_cast %193 : vector<16xf32> to vector<16x1xf32>
    %cst_71 = arith.constant 3.200000e+01 : f32
    %195 = vector.broadcast %cst_71 : f32 to vector<16x1xf32>
    %196 = arith.divf %194, %195 : vector<16x1xf32>
    %197 = vector.broadcast %196 : vector<16x1xf32> to vector<16x32xf32>
    %198 = arith.subf %192, %197 : vector<16x32xf32>
    %199 = arith.mulf %198, %198 : vector<16x32xf32>
    %cst_72 = arith.constant dense<0.000000e+00> : vector<16xf32>
    %200 = vector.multi_reduction <add>, %199, %cst_72 [1] : vector<16x32xf32> to vector<16xf32>
    %201 = vector.shape_cast %200 : vector<16xf32> to vector<16x1xf32>
    %cst_73 = arith.constant 3.200000e+01 : f32
    %202 = vector.broadcast %cst_73 : f32 to vector<16x1xf32>
    %203 = arith.divf %201, %202 : vector<16x1xf32>
    %204 = vector.broadcast %196 : vector<16x1xf32> to vector<16x32xf32>
    %205 = arith.subf %192, %204 : vector<16x32xf32>
    %cst_74 = arith.constant 9.99999974E-6 : f32
    %206 = vector.broadcast %cst_74 : f32 to vector<16x1xf32>
    %207 = arith.addf %203, %206 : vector<16x1xf32>
    %208 = math.rsqrt %207 : vector<16x1xf32>
    %209 = vector.broadcast %208 : vector<16x1xf32> to vector<16x32xf32>
    %210 = arith.mulf %205, %209 : vector<16x32xf32>
    %c0_75 = arith.constant 0 : index
    %c0_76 = arith.constant 0 : index
    %c0_77 = arith.constant 0 : index
    %211 = vector.load %arg7[%c0_75, %c0_76, %c0_77] : memref<1x1x32xf32, #tpu.memory_space<vmem>>, vector<1x1x32xf32>
    %212 = vector.shape_cast %211 : vector<1x1x32xf32> to vector<1x32xf32>
    %213 = vector.broadcast %212 : vector<1x32xf32> to vector<16x32xf32>
    %214 = arith.mulf %210, %213 : vector<16x32xf32>
    %c0_78 = arith.constant 0 : index
    %c0_79 = arith.constant 0 : index
    %c0_80 = arith.constant 0 : index
    %215 = vector.load %arg8[%c0_78, %c0_79, %c0_80] : memref<1x1x32xf32, #tpu.memory_space<vmem>>, vector<1x1x32xf32>
    %216 = vector.shape_cast %215 : vector<1x1x32xf32> to vector<1x32xf32>
    %217 = vector.broadcast %216 : vector<1x32xf32> to vector<16x32xf32>
    %218 = arith.addf %214, %217 : vector<16x32xf32>
    %219 = arith.truncf %218 : vector<16x32xf32> to vector<16x32xbf16>
    %c0_81 = arith.constant 0 : index
    %c0_82 = arith.constant 0 : index
    %c0_83 = arith.constant 0 : index
    %220 = vector.load %arg9[%c0_81, %c0_82, %c0_83] : memref<1x32x64xbf16, #tpu.memory_space<vmem>>, vector<1x32x64xbf16>
    %221 = vector.shape_cast %220 : vector<1x32x64xbf16> to vector<32x64xbf16>
    %cst_84 = arith.constant dense<0.000000e+00> : vector<16x64xf32>
    %222 = tpu.matmul %219, %221, %cst_84 {dimension_numbers = #tpu.dot_dimension_numbers<[1], [0], [0], [1], [0, 0, 1, 1], [], []>} : vector<16x32xbf16>, vector<32x64xbf16>, vector<16x64xf32> -> vector<16x64xf32>
    %c0_85 = arith.constant 0 : index
    %c0_86 = arith.constant 0 : index
    %c0_87 = arith.constant 0 : index
    %223 = vector.load %arg10[%c0_85, %c0_86, %c0_87] : memref<1x1x64xf32, #tpu.memory_space<vmem>>, vector<1x1x64xf32>
    %224 = vector.shape_cast %223 : vector<1x1x64xf32> to vector<1x64xf32>
    %225 = vector.broadcast %224 : vector<1x64xf32> to vector<16x64xf32>
    %226 = arith.addf %222, %225 : vector<16x64xf32>
    %cst_88 = arith.constant 0.000000e+00 : f32
    %227 = vector.broadcast %cst_88 : f32 to vector<16x64xf32>
    %228 = arith.maximumf %226, %227 : vector<16x64xf32>
    %229 = arith.truncf %228 : vector<16x64xf32> to vector<16x64xbf16>
    %c0_89 = arith.constant 0 : index
    %c0_90 = arith.constant 0 : index
    %c0_91 = arith.constant 0 : index
    %230 = vector.load %arg11[%c0_89, %c0_90, %c0_91] : memref<1x64x32xbf16, #tpu.memory_space<vmem>>, vector<1x64x32xbf16>
    %231 = vector.shape_cast %230 : vector<1x64x32xbf16> to vector<64x32xbf16>
    %cst_92 = arith.constant dense<0.000000e+00> : vector<16x32xf32>
    %232 = tpu.matmul %229, %231, %cst_92 {dimension_numbers = #tpu.dot_dimension_numbers<[1], [0], [0], [1], [0, 0, 1, 1], [], []>} : vector<16x64xbf16>, vector<64x32xbf16>, vector<16x32xf32> -> vector<16x32xf32>
    %c0_93 = arith.constant 0 : index
    %c0_94 = arith.constant 0 : index
    %c0_95 = arith.constant 0 : index
    %233 = vector.load %arg12[%c0_93, %c0_94, %c0_95] : memref<1x1x32xf32, #tpu.memory_space<vmem>>, vector<1x1x32xf32>
    %234 = vector.shape_cast %233 : vector<1x1x32xf32> to vector<1x32xf32>
    %235 = vector.broadcast %234 : vector<1x32xf32> to vector<16x32xf32>
    %236 = arith.addf %232, %235 : vector<16x32xf32>
    %237 = arith.addf %218, %236 : vector<16x32xf32>
    %cst_96 = arith.constant dense<0.000000e+00> : vector<16xf32>
    %238 = vector.multi_reduction <add>, %237, %cst_96 [1] : vector<16x32xf32> to vector<16xf32>
    %239 = vector.shape_cast %238 : vector<16xf32> to vector<16x1xf32>
    %cst_97 = arith.constant 3.200000e+01 : f32
    %240 = vector.broadcast %cst_97 : f32 to vector<16x1xf32>
    %241 = arith.divf %239, %240 : vector<16x1xf32>
    %242 = vector.broadcast %241 : vector<16x1xf32> to vector<16x32xf32>
    %243 = arith.subf %237, %242 : vector<16x32xf32>
    %244 = arith.mulf %243, %243 : vector<16x32xf32>
    %cst_98 = arith.constant dense<0.000000e+00> : vector<16xf32>
    %245 = vector.multi_reduction <add>, %244, %cst_98 [1] : vector<16x32xf32> to vector<16xf32>
    %246 = vector.shape_cast %245 : vector<16xf32> to vector<16x1xf32>
    %cst_99 = arith.constant 3.200000e+01 : f32
    %247 = vector.broadcast %cst_99 : f32 to vector<16x1xf32>
    %248 = arith.divf %246, %247 : vector<16x1xf32>
    %249 = vector.broadcast %241 : vector<16x1xf32> to vector<16x32xf32>
    %250 = arith.subf %237, %249 : vector<16x32xf32>
    %cst_100 = arith.constant 9.99999974E-6 : f32
    %251 = vector.broadcast %cst_100 : f32 to vector<16x1xf32>
    %252 = arith.addf %248, %251 : vector<16x1xf32>
    %253 = math.rsqrt %252 : vector<16x1xf32>
    %254 = vector.broadcast %253 : vector<16x1xf32> to vector<16x32xf32>
    %255 = arith.mulf %250, %254 : vector<16x32xf32>
    %c0_101 = arith.constant 0 : index
    %c0_102 = arith.constant 0 : index
    %c0_103 = arith.constant 0 : index
    %256 = vector.load %arg13[%c0_101, %c0_102, %c0_103] : memref<1x1x32xf32, #tpu.memory_space<vmem>>, vector<1x1x32xf32>
    %257 = vector.shape_cast %256 : vector<1x1x32xf32> to vector<1x32xf32>
    %258 = vector.broadcast %257 : vector<1x32xf32> to vector<16x32xf32>
    %259 = arith.mulf %255, %258 : vector<16x32xf32>
    %c0_104 = arith.constant 0 : index
    %c0_105 = arith.constant 0 : index
    %c0_106 = arith.constant 0 : index
    %260 = vector.load %arg14[%c0_104, %c0_105, %c0_106] : memref<1x1x32xf32, #tpu.memory_space<vmem>>, vector<1x1x32xf32>
    %261 = vector.shape_cast %260 : vector<1x1x32xf32> to vector<1x32xf32>
    %262 = vector.broadcast %261 : vector<1x32xf32> to vector<16x32xf32>
    %263 = arith.addf %259, %262 : vector<16x32xf32>
    %c0_107 = arith.constant 0 : index
    %c0_108 = arith.constant 0 : index
    %264 = vector.load %arg16[%c0_107, %c0_108] : memref<16x32xf32, #tpu.memory_space<vmem>>, vector<16x32xf32>
    tpu.vector_store %arg16[%c0_107, %c0_108], %263 {strides = array<i32>} : memref<16x32xf32, #tpu.memory_space<vmem>>, vector<16x32xf32>,
    %c0_109 = arith.constant 0 : index
    %c0_110 = arith.constant 0 : index
    %265 = vector.load %arg15[%c0_109, %c0_110] : memref<16x32xf32, #tpu.memory_space<vmem>>, vector<16x32xf32>
    tpu.vector_store %arg15[%c0_109, %c0_110], %263 {strides = array<i32>} : memref<16x32xf32, #tpu.memory_space<vmem>>, vector<16x32xf32>,
    return
  }
  func.func @transform_0(%arg0: i32) -> (i32, i32, i32) {
    %c0_i32 = arith.constant 0 : i32
    %c0_i32_0 = arith.constant 0 : i32
    %c0_i32_1 = arith.constant 0 : i32
    %c0_i32_2 = arith.constant 0 : i32
    return %c0_i32, %c0_i32_0, %c0_i32_1 : i32, i32, i32
  }
  func.func @transform_1(%arg0: i32) -> (i32, i32) {
    %c0_i32 = arith.constant 0 : i32
    %c0_i32_0 = arith.constant 0 : i32
    %c0_i32_1 = arith.constant 0 : i32
    return %c0_i32, %c0_i32_0 : i32, i32
  }
  func.func @transform_2(%arg0: i32) -> (i32, i32, i32) {
    %c0_i32 = arith.constant 0 : i32
    %c0_i32_0 = arith.constant 0 : i32
    %c0_i32_1 = arith.constant 0 : i32
    return %arg0, %c0_i32, %c0_i32_0 : i32, i32, i32
  }
  func.func @transform_3(%arg0: i32) -> (i32, i32, i32) {
    %c0_i32 = arith.constant 0 : i32
    %c0_i32_0 = arith.constant 0 : i32
    %c0_i32_1 = arith.constant 0 : i32
    return %arg0, %c0_i32, %c0_i32_0 : i32, i32, i32
  }
  func.func @transform_4(%arg0: i32) -> (i32, i32, i32) {
    %c0_i32 = arith.constant 0 : i32
    %c0_i32_0 = arith.constant 0 : i32
    %c0_i32_1 = arith.constant 0 : i32
    return %arg0, %c0_i32, %c0_i32_0 : i32, i32, i32
  }
  func.func @transform_5(%arg0: i32) -> (i32, i32, i32) {
    %c0_i32 = arith.constant 0 : i32
    %c0_i32_0 = arith.constant 0 : i32
    %c0_i32_1 = arith.constant 0 : i32
    return %arg0, %c0_i32, %c0_i32_0 : i32, i32, i32
  }
  func.func @transform_6(%arg0: i32) -> (i32, i32, i32) {
    %c0_i32 = arith.constant 0 : i32
    %c0_i32_0 = arith.constant 0 : i32
    %c0_i32_1 = arith.constant 0 : i32
    return %arg0, %c0_i32, %c0_i32_0 : i32, i32, i32
  }
  func.func @transform_7(%arg0: i32) -> (i32, i32, i32) {
    %c0_i32 = arith.constant 0 : i32
    %c0_i32_0 = arith.constant 0 : i32
    %c0_i32_1 = arith.constant 0 : i32
    return %arg0, %c0_i32, %c0_i32_0 : i32, i32, i32
  }
  func.func @transform_8(%arg0: i32) -> (i32, i32, i32) {
    %c0_i32 = arith.constant 0 : i32
    %c0_i32_0 = arith.constant 0 : i32
    %c0_i32_1 = arith.constant 0 : i32
    return %arg0, %c0_i32, %c0_i32_0 : i32, i32, i32
  }
  func.func @transform_9(%arg0: i32) -> (i32, i32, i32) {
    %c0_i32 = arith.constant 0 : i32
    %c0_i32_0 = arith.constant 0 : i32
    %c0_i32_1 = arith.constant 0 : i32
    return %arg0, %c0_i32, %c0_i32_0 : i32, i32, i32
  }
  func.func @transform_10(%arg0: i32) -> (i32, i32, i32) {
    %c0_i32 = arith.constant 0 : i32
    %c0_i32_0 = arith.constant 0 : i32
    %c0_i32_1 = arith.constant 0 : i32
    return %arg0, %c0_i32, %c0_i32_0 : i32, i32, i32
  }
  func.func @transform_11(%arg0: i32) -> (i32, i32, i32) {
    %c0_i32 = arith.constant 0 : i32
    %c0_i32_0 = arith.constant 0 : i32
    %c0_i32_1 = arith.constant 0 : i32
    return %arg0, %c0_i32, %c0_i32_0 : i32, i32, i32
  }
  func.func @transform_12(%arg0: i32) -> (i32, i32, i32) {
    %c0_i32 = arith.constant 0 : i32
    %c0_i32_0 = arith.constant 0 : i32
    %c0_i32_1 = arith.constant 0 : i32
    return %arg0, %c0_i32, %c0_i32_0 : i32, i32, i32
  }
  func.func @transform_13(%arg0: i32) -> (i32, i32, i32) {
    %c0_i32 = arith.constant 0 : i32
    %c0_i32_0 = arith.constant 0 : i32
    %c0_i32_1 = arith.constant 0 : i32
    return %arg0, %c0_i32, %c0_i32_0 : i32, i32, i32
  }
  func.func @transform_14(%arg0: i32) -> (i32, i32) {
    %c0_i32 = arith.constant 0 : i32
    %c0_i32_0 = arith.constant 0 : i32
    %c0_i32_1 = arith.constant 0 : i32
    return %c0_i32, %c0_i32_0 : i32, i32
  }
}

</mosaic_0001>

<bundles_post_ra>
// kernel: inc_encoder_forward.1
= control target key start
LH: loop header
LB: loop body
LE: loop exit
PB: predicated region body
PF: predicated region fallthrough
CT: control target
= control target key end

     0   :  { %s3340_s0 = inlined_call_operand.vmem [shape: f32[2,1,8], index: 0, kind: input, shape index: {}]   ;;  %s3341_s1 = inlined_call_operand.vmem [shape: f32[16,32], index: 1, kind: input, shape index: {}]   ;;  %s3342_s2 = inlined_call_operand.vmem [shape: bf16[2,32,96], index: 2, kind: input, shape index: {}]   ;;  %s3343_s3 = inlined_call_operand.vmem [shape: f32[2,1,96], index: 3, kind: input, shape index: {}]   ;;  %s3344_s4 = inlined_call_operand.vmem [shape: bf16[2,32,32], index: 4, kind: input, shape index: {}]   ;;  %s3345_s5 = inlined_call_operand.vmem [shape: f32[2,1,32], index: 5, kind: input, shape index: {}]   ;;  %s3346_s6 = inlined_call_operand.vmem [shape: f32[2,1,32], index: 6, kind: input, shape index: {}]   ;;  %s3347_s7 = inlined_call_operand.vmem [shape: f32[2,1,32], index: 7, kind: input, shape index: {}]   ;;  %s3348_s8 = inlined_call_operand.vmem [shape: bf16[2,32,64], index: 8, kind: input, shape index: {}]   ;;  %s3349_s9 = inlined_call_operand.vmem [shape: f32[2,1,64], index: 9, kind: input, shape index: {}]   ;;  %s3350_s10 = inlined_call_operand.vmem [shape: bf16[2,64,32], index: 10, kind: input, shape index: {}]   ;;  %s3351_s11 = inlined_call_operand.vmem [shape: f32[2,1,32], index: 11, kind: input, shape index: {}]   ;;  %s3352_s12 = inlined_call_operand.vmem [shape: f32[2,1,32], index: 12, kind: input, shape index: {}]   ;;  %s3353_s13 = inlined_call_operand.vmem [shape: f32[2,1,32], index: 13, kind: input, shape index: {}]   ;;  %s3354_s14 = inlined_call_operand.hbm [shape: f32[16,32], index: 14, kind: output, shape index: {}]  }
   0x1   :  { %3359 = sst [smem:[#allocation7_spill]] %s3340_s0 }
   0x2   :  { %3360 = sst [smem:[#allocation8_spill]] %s3341_s1 }
   0x3   :  { %3361 = sst [smem:[#allocation9_spill]] %s3342_s2 }
   0x4   :  { %3362 = sst [smem:[#allocation10_spill]] %s3344_s4 }
   0x5   :  { %3363 = sst [smem:[#allocation11_spill]] %s3354_s14 }
   0x6   :  { %19 = vsyncpa [#allocation4], 0  ;;  %s3009_s29 = smov 0  }
   0x7 LB: > { %3364 = sst [smem:[#allocation6_spill]] %s2914_s29  ;;  %s3015_s30 = sadd.s32 4294967295, %s2914_s29   ;;  %s2914_s29 = sphi %s3009_s29, %s25_s29  }
   0x8   : > { %p2552_p0 = scmp.ge.s32.totalorder %s2914_s29, 1  ;;  %p502_p1 = scmp.lt.s32.totalorder %s2914_s29, 3 }
   0xa   : > { %p503_p2 = pnand %p2552_p0, %p502_p1 }
   0xb   : > { %p582_p3 = scmp.lt.s32.totalorder (!%p503_p2), %s3015_s30, 1  ;;  %s3365_s2 = sld [smem:[#allocation9_spill]] (!%p503_p2) }
   0xc   : > { %506 = sbr.rel (%p503_p2) target bundleno = 3138 (0xc42), region = 76  ;;  %s3366_s4 = sld [smem:[#allocation10_spill]] (!%p503_p2) }
   0xd   : > { %p2561_p4 = scmp.ne.s32.totalorder (!%p503_p2), %s3015_s30, 0 }
  0x13   : > { %s3021_s15 = scalar_select %p582_p3, %s3015_s30, 1 }
  0x14   : > { %630 = sbr.rel (%p2561_p4) target bundleno = 28 (0x1c), region = 80  ;;  %s3367_s26 = sld [smem:[#allocation8_spill]] (!%p2561_p4)  ;;  %vm633_vm0 = vcmask (!%p2561_p4), 261120  }
  0x15   : > { %s2615_s16 = sshll.u32 %s3021_s15, 4  ;;  %s619_s1 = scalar_lea.vmem %s3351_s11, %s3021_s15 }
  0x16   : > { %s586_s22 = scalar_lea.vmem %s3365_s2, %s2615_s16  ;;  %s3034_s25 = scalar_lea.vmem %s3366_s4, %s2615_s16 }
  0x17   : > { %s3051_s21 = scalar_lea.vmem %s3348_s8, %s2615_s16  ;;  %s611_s2 = scalar_lea.vmem %s3349_s9, %s3021_s15 }
  0x18   : > { %s2618_s4 = sshll.u32 %s3021_s15, 5  ;;  %s622_s19 = scalar_lea.vmem %s3352_s12, %s3021_s15 }
  0x19   : > { %s3061_s28 = scalar_lea.vmem %s3350_s10, %s2618_s4  ;;  %s625_s0 = scalar_lea.vmem %s3353_s13, %s3021_s15 }
  0x1a   : > { %v631_v0 = vld [vmem:[%s3367_s26] sm:$0xff] (!%p2561_p4)  ;;  %v632_v1 = vld [vmem:[%s3367_s26 + $0x8] sm:$0xff] (!%p2561_p4) }
  0x1b   : > { %634 = vst.msk [vmem:[#allocation2] sm:$0xff] %vm633_vm0, %v631_v0  ;;  %635 = vst.msk [vmem:[#allocation2 + $0x8] sm:$0xff] %vm633_vm0, %v632_v1 }
  0x1c PF: > { %v2828_v2 = vld [vmem:[%s586_s22] sm:$0xff]   ;;  %v2916_v3 = vmov 0.0   ;;  %v2829_v4 = vld [vmem:[%s586_s22 + $0x8] sm:$0xff]   ;;  %vm2917_vm1 = vmmov 0   ;;  %vm662_vm2 = vcmask 261120   ;;  %s3368_s14 = scalar_lea.vmem %s3343_s3, %s3021_s15  ;;  %s2918_s29 = smov 64  }
  0x1d   : > { %2665 = vmatprep.subr.bf16.mxu0 %v2916_v3  ;;  %2678 = vmatprep.subr.mxu1 %v2916_v3  ;;  %v2562_v8 = vld [vmem:[%s3368_s14] ss:$0 sm:$0xff]  ;;  %s2919_s17 = smov 96   ;;  %s2920_s16 = smov 88   ;;  %vm717_vm3 = vcmask 64512   ;;  %vm2067_vm4 = vcmask 130048  }
  0x1e   : > { %2666 = vmatpush3.bf16.msra.mxu0 %v2828_v2  ;;  %2669 = vmatprep.mubr.msk.bf16.mxu0 %vm2917_vm1, %v2916_v3  ;;  %s2921_s20 = smov 120   ;;  %s2922_s23 = smov 80   ;;  %vm2070_vm5 = vcmask 195584   ;;  %vm2298_vm6 = vcmask 523264  }
  0x1f   : > { %2667 = vmatprep.subr.bf16.mxu0 %v2916_v3  ;;  %2680 = vmatprep.mubr.msk.f32.mxu1 %vm2917_vm1, %v2916_v3  ;;  %s3369_s27 = sld [smem:[#allocation7_spill]]  ;;  %s2923_s22 = smov 104  }
  0x20   : > { %s2924_s18 = smov 112   ;;  %s2925_s14 = smov 72  }
  0x21   : > { %s2929_s24 = smov 8   ;;  %s2930_s4 = smov 16  }
  0x22   : > { %v3086_v5 = vld [vmem:[#allocation2] sm:$0xff]  ;;  %v3088_v6 = vld [vmem:[#allocation2 + $0x8] sm:$0xff]  ;;  %2668 = vmatpush3.bf16.msra.mxu0 %v2829_v4  ;;  %p2785_p5 = scmp.eq.s32.totalorder %s3015_s30, 1 }
  0x23   : > { %v638_v7 = vpack.c.bf16 %v3088_v6, %v3086_v5  ;;  %2673 = vmatprep.subr.mxu0 %v2916_v3 }
  0x25   : > { %2670 = vmatmul.mubr.msk.bf16.vlgmr.msra.gmra.mrb[0].mxu0 %vm662_vm2, %v638_v7  ;;  %v3127_v17 = vld [vmem:[%s3369_s27] ss:$0 sm:$0xff]  ;;  %v2571_v45 = vld [vmem:[%s3369_s27 + $0x1] ss:$0 sm:$0xff] }
  0x26   : > { %2675 = vmatprep.mubr.msk.f32.mxu0 %vm2917_vm1, %v2916_v3 }
  0xf8   : > { %v700_v9 = vpop.f32.mrb[0].mxu0 }
  0xf9   : > { %v3104_v10 = vadd.f32 %v2562_v8, %v700_v9  ;;  %v2671_v11 = vpop.f32.mrb[1].mxu0 }
  0xfa   : > { %v703_v12 = vpop.f32.mrb[2].mxu0 }
  0xfb   : > { %803 = vrot.lane.b32.xlu1 %v3104_v10, %s2918_s29  ;;  %715 = vrot.lane.b32.xlu0 %v3104_v10, %s2919_s17  ;;  %v2672_v13 = vpop.f32.mrb[3].mxu0  ;;  %v3109_v14 = vadd.f32 %v2562_v8, %v703_v12 }
  0xff   : > { %888 = vrot.lane.b32.xlu1 %v3109_v14, %s2919_s17 }
 0x103   : > { %1053 = vrot.lane.b32.xlu1 %v3104_v10, %s2920_s16 }
 0x107   : > { %1051 = vrot.lane.b32.xlu1 %v3104_v10, %s2921_s20 }
 0x10b   : > { %1218 = vrot.lane.b32.xlu1 %v3109_v14, %s2920_s16  ;;  %s3371_s16 = scalar_lea.vmem %s3346_s6, %s3021_s15 }
 0x10f   : > { %1383 = vrot.lane.b32.xlu1 %v3104_v10, %s2922_s23 }
 0x16d   : > { %v804_v15 = vpop.permute.xlu1 %803  ;;  %v716_v16 = vpop.permute.xlu0 %715 }
 0x16e   : > { %2674 = vmatpush3.xpose.msk.msra.mxu0 %vm717_vm3, %v716_v16  ;;  %2679 = vmatpush3.msra.mxu1 %v804_v15 }
 0x16f   : > { %2683 = vmatprep.subr.mxu1 %v2916_v3  ;;  %2688 = vmatprep.subr.mxu0 %v2916_v3 }
 0x171   : > { %2676 = vmatmul.mubr.msk.f32.vlgmr.msra.gmra.mrb[4].mxu0 %vm717_vm3, %v3104_v10  ;;  %v889_v27 = vpop.permute.xlu1 %888 }
 0x172   : > { %2690 = vmatprep.mubr.msk.f32.mxu0 %vm2917_vm1, %v2916_v3 }
 0x175   : > { %v1054_v28 = vpop.permute.xlu1 %1053 }
 0x179   : > { %v1052_v29 = vpop.permute.xlu1 %1051 }
 0x17d   : > { %v1219_v30 = vpop.permute.xlu1 %1218 }
 0x181   : > { %v1384_v31 = vpop.permute.xlu1 %1383 }
 0x244   : > { %v788_v18 = vpop.f32.mrb[4].mxu0 }
 0x245   : > { %v789_v19 = vadd.f32 %v3127_v17, %v788_v18  ;;  %v2677_v20 = vpop.f32.mrb[5].mxu0 }
 0x247   : > { %v792_v21 = vsel %vm717_vm3, %v789_v19, -inf }
 0x248   : > { %793 = vmax.xlane.f32.xlu0 %v792_v21 }
 0x25e   : > { %1216 = vrot.lane.b32.xlu0 %v3109_v14, %s2921_s20  ;;  %s2926_s20 = smov 56  }
 0x262   : > { %1711 = vrot.lane.b32.xlu0 %v3104_v10, %s2923_s22 }
 0x266   : > { %1876 = vrot.lane.b32.xlu0 %v3109_v14, %s2923_s22  ;;  %s2931_s22 = smov 24  }
 0x2d5   : > { %v794_v22 = vpop.xlane.xlu0 %793 }
 0x2d6   : > { %v795_v23 = vsub.f32 %v789_v19, %v794_v22 }
 0x2d8   : > { %v796_v24 = vmul.f32 1.442695, %v795_v23 }
 0x2d9   : > { %v1217_v37 = vpop.permute.xlu0 %1216 }
 0x2da   : > { %2838 = vpow2.f32 %v796_v24 }
 0x2dd   : > { %v1712_v40 = vpop.permute.xlu0 %1711 }
 0x2e1   : > { %v1877_v42 = vpop.permute.xlu0 %1876 }
 0x2e4   : > { %v2839_v25 = vpop.eup %2838 }
 0x2e5   : > { %v798_v26 = vsel %vm717_vm3, %v2839_v25, 0.0 }
 0x2e6   : > { %799 = vadd.xlane.f32.xlu1 %v798_v26 }
 0x2f7   : > { %1381 = vrot.lane.b32.xlu1 %v3104_v10, %s2924_s18 }
 0x2fb   : > { %1548 = vrot.lane.b32.xlu1 %v3109_v14, %s2922_s23  ;;  %s2928_s23 = smov 40  }
 0x2ff   : > { %1546 = vrot.lane.b32.xlu1 %v3109_v14, %s2924_s18 }
 0x303   : > { %1713 = vrot.lane.b32.xlu1 %v3104_v10, %s2925_s14 }
 0x307   : > { %1878 = vrot.lane.b32.xlu1 %v3109_v14, %s2925_s14  ;;  %s3370_s14 = scalar_lea.vmem %s3345_s5, %s3021_s15 }
 0x373   : > { %v800_v32 = vpop.xlane.xlu1 %799 }
 0x374   : > { %2840 = vrcp.f32 %v800_v32 }
 0x377   : > { %v1382_v35 = vpop.permute.xlu1 %1381 }
 0x37b   : > { %v1549_v36 = vpop.permute.xlu1 %1548 }
 0x37e   : > { %v2841_v33 = vpop.eup %2840 }
 0x37f   : > { %v802_v34 = vmul.f32 %v2841_v33, %v2839_v25  ;;  %v1547_v38 = vpop.permute.xlu1 %1546 }
 0x381   : > { %2681 = vmatmul.mubr.msk.f32.vlgmr.msra.gmra.mrb[0].mxu1 %vm717_vm3, %v802_v34 }
 0x382   : > { %2684 = vmatpush3.xpose.msk.msra.mxu1 %vm717_vm3, %v889_v27  ;;  %2685 = vmatprep.mubr.msk.f32.mxu1 %vm2917_vm1, %v2916_v3 }
 0x383   : > { %2693 = vmatprep.subr.mxu1 %v2916_v3  ;;  %v1714_v39 = vpop.permute.xlu1 %1713 }
 0x385   : > { %2686 = vmatmul.mubr.msk.f32.vlgmr.msra.gmra.mrb[2].mxu1 %vm717_vm3, %v3109_v14 }
 0x386   : > { %2694 = vmatpush3.xpose.msk.msra.mxu1 %vm717_vm3, %v1054_v28  ;;  %2695 = vmatprep.mubr.msk.f32.mxu1 %vm2917_vm1, %v2916_v3 }
 0x387   : > { %2703 = vmatprep.subr.mxu1 %v2916_v3  ;;  %v1879_v41 = vpop.permute.xlu1 %1878 }
 0x389   : > { %2696 = vmatmul.mubr.msk.f32.vlgmr.msra.gmra.mrb[4].mxu1 %vm717_vm3, %v1052_v29 }
 0x38a   : > { %2704 = vmatpush3.xpose.msk.msra.mxu1 %vm717_vm3, %v1219_v30  ;;  %2705 = vmatprep.mubr.msk.f32.mxu1 %vm2917_vm1, %v2916_v3 }
 0x38b   : > { %2713 = vmatprep.subr.mxu1 %v2916_v3 }
 0x38d   : > { %2706 = vmatmul.mubr.msk.f32.vlgmr.msra.gmra.mrb[6].mxu1 %vm717_vm3, %v1217_v37 }
 0x38e   : > { %2714 = vmatpush3.xpose.msk.msra.mxu1 %vm717_vm3, %v1384_v31  ;;  %2715 = vmatprep.mubr.msk.f32.mxu1 %vm2917_vm1, %v2916_v3 }
 0x38f   : > { %2723 = vmatprep.subr.mxu1 %v2916_v3 }
 0x391   : > { %2716 = vmatmul.mubr.msk.f32.vlgmr.msra.gmra.mrb[8].mxu1 %vm717_vm3, %v1382_v35 }
 0x392   : > { %2724 = vmatpush3.xpose.msk.msra.mxu1 %vm717_vm3, %v1549_v36  ;;  %2725 = vmatprep.mubr.msk.f32.mxu1 %vm2917_vm1, %v2916_v3 }
 0x393   : > { %2733 = vmatprep.subr.mxu1 %v2916_v3 }
 0x395   : > { %2726 = vmatmul.mubr.msk.f32.vlgmr.msra.gmra.mrb[10].mxu1 %vm717_vm3, %v1547_v38 }
 0x396   : > { %2734 = vmatpush3.xpose.msk.msra.mxu1 %vm717_vm3, %v1714_v39  ;;  %2735 = vmatprep.mubr.msk.f32.mxu1 %vm2917_vm1, %v2916_v3 }
 0x397   : > { %2743 = vmatprep.subr.mxu1 %v2916_v3 }
 0x399   : > { %2736 = vmatmul.mubr.msk.f32.vlgmr.msra.gmra.mrb[12].mxu1 %vm717_vm3, %v1712_v40 }
 0x39a   : > { %2744 = vmatpush3.xpose.msk.msra.mxu1 %vm717_vm3, %v1879_v41  ;;  %2745 = vmatprep.mubr.msk.f32.mxu1 %vm2917_vm1, %v2916_v3 }
 0x39b   : > { %2753 = vmatprep.subr.bf16.mxu1 %v2916_v3 }
 0x39d   : > { %2746 = vmatmul.mubr.msk.f32.vlgmr.msra.gmra.mrb[14].mxu1 %vm717_vm3, %v1877_v42 }
 0x39e   : > { %2757 = vmatprep.mubr.msk.bf16.mxu1 %vm2917_vm1, %v2916_v3 }
 0x454   : > { %v3180_v43 = vpop.f32.mrb[0].mxu1 }
 0x455   : > { %v2682_v44 = vpop.f32.mrb[1].mxu1 }
 0x458   : > { %v960_v46 = vpop.f32.mrb[2].mxu1 }
 0x459   : > { %v961_v47 = vadd.f32 %v2571_v45, %v960_v46  ;;  %v2687_v48 = vpop.f32.mrb[3].mxu1 }
 0x45b   : > { %v964_v49 = vsel %vm717_vm3, %v961_v47, -inf }
 0x45c   : > { %965 = vmax.xlane.f32.xlu1 %v964_v49  ;;  %v1125_v50 = vpop.f32.mrb[4].mxu1 }
 0x45d   : > { %v1126_v51 = vadd.f32 %v3127_v17, %v1125_v50  ;;  %v2697_v52 = vpop.f32.mrb[5].mxu1 }
 0x45f   : > { %v1129_v53 = vsel %vm717_vm3, %v1126_v51, -inf }
 0x460   : > { %1130 = vmax.xlane.f32.xlu0 %v1129_v53  ;;  %v1290_v54 = vpop.f32.mrb[6].mxu1 }
 0x461   : > { %v1291_v55 = vadd.f32 %v2571_v45, %v1290_v54  ;;  %v2707_v56 = vpop.f32.mrb[7].mxu1 }
 0x463   : > { %v1294_v57 = vsel %vm717_vm3, %v1291_v55, -inf }
 0x464   : > { %1295 = vmax.xlane.f32.xlu0 %v1294_v57  ;;  %v1455_v58 = vpop.f32.mrb[8].mxu1 }
 0x465   : > { %v1456_v59 = vadd.f32 %v3127_v17, %v1455_v58  ;;  %v2717_v60 = vpop.f32.mrb[9].mxu1 }
 0x467   : > { %v1459_v61 = vsel %vm717_vm3, %v1456_v59, -inf }
 0x468   : > { %1460 = vmax.xlane.f32.xlu1 %v1459_v61  ;;  %v1620_v62 = vpop.f32.mrb[10].mxu1 }
 0x469   : > { %v1621_v63 = vadd.f32 %v2571_v45, %v1620_v62  ;;  %v2727_v0 = vpop.f32.mrb[11].mxu1 }
 0x46b   : > { %v1624_v1 = vsel %vm717_vm3, %v1621_v63, -inf }
 0x46c   : > { %1625 = vmax.xlane.f32.xlu0 %v1624_v1  ;;  %v1785_v2 = vpop.f32.mrb[12].mxu1 }
 0x46d   : > { %v1786_v4 = vadd.f32 %v3127_v17, %v1785_v2  ;;  %v2737_v7 = vpop.f32.mrb[13].mxu1 }
 0x46f   : > { %v1789_v8 = vsel %vm717_vm3, %v1786_v4, -inf }
 0x470   : > { %1790 = vmax.xlane.f32.xlu1 %v1789_v8  ;;  %v1950_v9 = vpop.f32.mrb[14].mxu1 }
 0x471   : > { %v1951_v11 = vadd.f32 %v2571_v45, %v1950_v9  ;;  %v2747_v12 = vpop.f32.mrb[15].mxu1 }
 0x473   : > { %v1954_v13 = vsel %vm717_vm3, %v1951_v11, -inf }
 0x474   : > { %1955 = vmax.xlane.f32.xlu0 %v1954_v13 }
 0x481   : > { %1140 = vrot.lane.b32.xlu1 %v3104_v10, %s2926_s20 }
 0x485   : > { %1305 = vrot.lane.b32.xlu1 %v3109_v14, %s2926_s20 }
 0x48a   : > { %975 = vrot.lane.b32.xlu0 %v3109_v14, %s2918_s29  ;;  %s2927_s29 = smov 48  }
 0x4e9   : > { %v966_v15 = vpop.xlane.xlu1 %965 }
 0x4ea   : > { %v967_v16 = vsub.f32 %v961_v47, %v966_v15 }
 0x4ec   : > { %v968_v17 = vmul.f32 1.442695, %v967_v16 }
 0x4ed   : > { %v1131_v18 = vpop.xlane.xlu0 %1130 }
 0x4ee   : > { %2842 = vpow2.f32 %v968_v17  ;;  %v1132_v19 = vsub.f32 %v1126_v51, %v1131_v18 }
 0x4f0   : > { %v1133_v20 = vmul.f32 1.442695, %v1132_v19 }
 0x4f1   : > { %v1296_v22 = vpop.xlane.xlu0 %1295 }
 0x4f2   : > { %2844 = vpow2.f32 %v1133_v20  ;;  %v1297_v29 = vsub.f32 %v1291_v55, %v1296_v22 }
 0x4f4   : > { %v1298_v32 = vmul.f32 1.442695, %v1297_v29 }
 0x4f5   : > { %v1461_v30 = vpop.xlane.xlu1 %1460 }
 0x4f6   : > { %v1462_v31 = vsub.f32 %v1456_v59, %v1461_v30  ;;  %2846 = vpow2.f32 %v1298_v32 }
 0x4f8   : > { %v2843_v21 = vpop.eup %2842  ;;  %v1463_v35 = vmul.f32 1.442695, %v1462_v31 }
 0x4f9   : > { %v970_v23 = vsel %vm717_vm3, %v2843_v21, 0.0  ;;  %v1626_v25 = vpop.xlane.xlu0 %1625 }
 0x4fa   : > { %971 = vadd.xlane.f32.xlu1 %v970_v23  ;;  %v1627_v33 = vsub.f32 %v1621_v63, %v1626_v25  ;;  %2848 = vpow2.f32 %v1463_v35  ;;  %v2830_v25 = vld [vmem:[%s3034_s25] sm:$0xff]  }
 0x4fb   : > { %2754 = vmatpush3.bf16.msra.mxu1 %v2830_v25 }
 0x4fc   : > { %v2845_v24 = vpop.eup %2844  ;;  %v1628_v37 = vmul.f32 1.442695, %v1627_v33  ;;  %2755 = vmatprep.subr.bf16.mxu1 %v2916_v3 }
 0x4fd   : > { %v1135_v26 = vsel %vm717_vm3, %v2845_v24, 0.0  ;;  %v1791_v34 = vpop.xlane.xlu1 %1790 }
 0x4fe   : > { %1136 = vadd.xlane.f32.xlu0 %v1135_v26  ;;  %v1792_v36 = vsub.f32 %v1786_v4, %v1791_v34  ;;  %2850 = vpow2.f32 %v1628_v37 }
 0x500   : > { %v1793_v39 = vmul.f32 1.442695, %v1792_v36  ;;  %v2847_v41 = vpop.eup %2846 }
 0x501   : > { %v1956_v27 = vpop.xlane.xlu0 %1955  ;;  %v1300_v44 = vsel %vm717_vm3, %v2847_v41, 0.0  ;;  %v1141_v52 = vpop.permute.xlu1 %1140 }
 0x502   : > { %v1957_v38 = vsub.f32 %v1951_v11, %v1956_v27  ;;  %2852 = vpow2.f32 %v1793_v39 }
 0x504   : > { %v1958_v40 = vmul.f32 1.442695, %v1957_v38  ;;  %v2849_v42 = vpop.eup %2848 }
 0x505   : > { %v976_v28 = vpop.permute.xlu0 %975  ;;  %v1465_v47 = vsel %vm717_vm3, %v2849_v42, 0.0  ;;  %v1306_v53 = vpop.permute.xlu1 %1305 }
 0x506   : > { %2689 = vmatpush3.msra.mxu0 %v976_v28  ;;  %2854 = vpow2.f32 %v1958_v40  ;;  %v2831_v28 = vld [vmem:[%s3034_s25 + $0x8] sm:$0xff]  }
 0x507   : > { %2698 = vmatprep.subr.mxu0 %v2916_v3  ;;  %2756 = vmatpush3.bf16.msra.mxu1 %v2831_v28 }
 0x508   : > { %v2851_v45 = vpop.eup %2850  ;;  %2769 = vmatprep.subr.bf16.mxu1 %v2916_v3 }
 0x509   : > { %v1630_v48 = vsel %vm717_vm3, %v2851_v45, 0.0 }
 0x50b   : > { %1635 = vrot.lane.b32.xlu1 %v3109_v14, %s2927_s29 }
 0x50c   : > { %v2853_v46 = vpop.eup %2852 }
 0x50d   : > { %v1795_v50 = vsel %vm717_vm3, %v2853_v46, 0.0 }
 0x510   : > { %v3207_v49 = vpop.eup %2854 }
 0x511   : > { %v1960_v51 = vsel %vm717_vm3, %v3207_v49, 0.0 }
 0x514   : > { %1470 = vrot.lane.b32.xlu0 %v3104_v10, %s2927_s29 }
 0x52f   : > { %1301 = vadd.xlane.f32.xlu1 %v1300_v44 }
 0x533   : > { %1466 = vadd.xlane.f32.xlu0 %v1465_v47  ;;  %1631 = vadd.xlane.f32.xlu1 %v1630_v48 }
 0x537   : > { %1796 = vadd.xlane.f32.xlu0 %v1795_v50  ;;  %1961 = vadd.xlane.f32.xlu1 %v1960_v51 }
 0x548   : > { %1965 = vrot.lane.b32.xlu1 %v3109_v14, %s2928_s23 }
 0x54d   : > { %1800 = vrot.lane.b32.xlu0 %v3104_v10, %s2928_s23  ;;  %s3372_s23 = scalar_lea.vmem %s3347_s7, %s3021_s15 }
 0x587   : > { %v972_v54 = vpop.xlane.xlu1 %971 }
 0x588   : > { %2856 = vrcp.f32 %v972_v54  ;;  %v2593_v54 = vld [vmem:[%s3370_s14] ss:$0 sm:$0xff] }
 0x58b   : > { %v1137_v55 = vpop.xlane.xlu0 %1136  ;;  %v1636_v10 = vpop.permute.xlu1 %1635 }
 0x58c   : > { %2858 = vrcp.f32 %v1137_v55 }
 0x58f   : > { %v1471_v14 = vpop.permute.xlu0 %1470 }
 0x592   : > { %v2857_v56 = vpop.eup %2856 }
 0x593   : > { %v974_v57 = vmul.f32 %v2857_v56, %v2843_v21 }
 0x595   : > { %2691 = vmatmul.mubr.msk.f32.vlgmr.msra.gmra.mrb[6].mxu0 %vm717_vm3, %v974_v57 }
 0x596   : > { %v2859_v58 = vpop.eup %2858  ;;  %2699 = vmatpush3.msra.mxu0 %v1141_v52  ;;  %2700 = vmatprep.mubr.msk.f32.mxu0 %vm2917_vm1, %v2916_v3 }
 0x597   : > { %v1139_v59 = vmul.f32 %v2859_v58, %v2845_v24  ;;  %2708 = vmatprep.subr.mxu0 %v2916_v3 }
 0x599   : > { %2701 = vmatmul.mubr.msk.f32.vlgmr.msra.gmra.mrb[8].mxu0 %vm717_vm3, %v1139_v59 }
 0x59a   : > { %2709 = vmatpush3.msra.mxu0 %v1306_v53  ;;  %2710 = vmatprep.mubr.msk.f32.mxu0 %vm2917_vm1, %v2916_v3 }
 0x59b   : > { %2718 = vmatprep.subr.mxu0 %v2916_v3 }
 0x5bc   : > { %v1302_v60 = vpop.xlane.xlu1 %1301 }
 0x5bd   : > { %2860 = vrcp.f32 %v1302_v60 }
 0x5c0   : > { %v1467_v61 = vpop.xlane.xlu0 %1466  ;;  %v1632_v62 = vpop.xlane.xlu1 %1631 }
 0x5c1   : > { %2862 = vrcp.f32 %v1467_v61 }
 0x5c2   : > { %2864 = vrcp.f32 %v1632_v62 }
 0x5c4   : > { %v1797_v63 = vpop.xlane.xlu0 %1796  ;;  %v1962_v2 = vpop.xlane.xlu1 %1961 }
 0x5c5   : > { %2866 = vrcp.f32 %v1797_v63 }
 0x5c6   : > { %2868 = vrcp.f32 %v1962_v2 }
 0x5c7   : > { %v2861_v0 = vpop.eup %2860 }
 0x5c8   : > { %v1304_v1 = vmul.f32 %v2861_v0, %v2847_v41  ;;  %v1801_v12 = vpop.permute.xlu0 %1800  ;;  %v1966_v16 = vpop.permute.xlu1 %1965 }
 0x5ca   : > { %2711 = vmatmul.mubr.msk.f32.vlgmr.msra.gmra.mrb[10].mxu0 %vm717_vm3, %v1304_v1 }
 0x5cb   : > { %2719 = vmatpush3.msra.mxu0 %v1471_v14  ;;  %2720 = vmatprep.mubr.msk.f32.mxu0 %vm2917_vm1, %v2916_v3  ;;  %v2863_v4 = vpop.eup %2862 }
 0x5cc   : > { %2728 = vmatprep.subr.mxu0 %v2916_v3  ;;  %v1469_v7 = vmul.f32 %v2863_v4, %v2849_v42  ;;  %v2865_v8 = vpop.eup %2864 }
 0x5cd   : > { %v1634_v9 = vmul.f32 %v2865_v8, %v2851_v45 }
 0x5ce   : > { %2721 = vmatmul.mubr.msk.f32.vlgmr.msra.gmra.mrb[12].mxu0 %vm717_vm3, %v1469_v7 }
 0x5cf   : > { %2729 = vmatpush3.msra.mxu0 %v1636_v10  ;;  %2730 = vmatprep.mubr.msk.f32.mxu0 %vm2917_vm1, %v2916_v3  ;;  %v2867_v11 = vpop.eup %2866 }
 0x5d0   : > { %2738 = vmatprep.subr.mxu0 %v2916_v3  ;;  %v1799_v13 = vmul.f32 %v2867_v11, %v2853_v46  ;;  %v2869_v15 = vpop.eup %2868  ;;  %v2833_v11 = vld [vmem:[%s3051_s21 + $0x8] sm:$0xff]  }
 0x5d1   : > { %v1964_v17 = vmul.f32 %v2869_v15, %v3207_v49 }
 0x5d2   : > { %2731 = vmatmul.mubr.msk.f32.vlgmr.msra.gmra.mrb[14].mxu0 %vm717_vm3, %v1634_v9  ;;  %v2832_v9 = vld [vmem:[%s3051_s21] sm:$0xff]   ;;  %s2932_s21 = smov [#allocation3]  }
 0x5d3   : > { %2739 = vmatpush3.msra.mxu0 %v1801_v12  ;;  %2740 = vmatprep.mubr.msk.f32.mxu0 %vm2917_vm1, %v2916_v3  ;;  %v2834_v12 = vld [vmem:[%s3061_s28] sm:$0xff]   ;;  %s2399_s17 = sshll.u32 %s2932_s21, 4  ;;  %s2400_s17 = int_to_ptr.vmem [resolvable:$true] %s2399_s17 }
 0x5d4   : > { %2748 = vmatprep.subr.mxu0 %v2916_v3  ;;  %s2878_s15 = scalar_lea.vmem %s2400_s17, 256  ;;  %p2885_p9 = scmp.lt.s32.totalorder %s2400_s17, %s2400_s17 }
 0x5d5   : > { %p2879_p6 = scmp.ne.s32.totalorder %s2400_s17, %s2878_s15  ;;  %p2886_p10 = scmp.lt.s32.totalorder %s2878_s15, %s2878_s15 }
 0x5d6   : > { %2741 = vmatmul.mubr.msk.f32.vlgmr.msra.gmra.mrb[16].mxu0 %vm717_vm3, %v1799_v13  ;;  %v2835_v13 = vld [vmem:[%s3061_s28 + $0x8] sm:$0xff]  }
 0x5d7   : > { %2749 = vmatpush3.msra.mxu0 %v1966_v16  ;;  %2750 = vmatprep.mubr.msk.f32.mxu0 %vm2917_vm1, %v2916_v3  ;;  %p2880_p7 = pnand %p2879_p6, %p2785_p5  ;;  %p2887_p11 = por %p2886_p10, %p2885_p9 }
 0x5d8   : > { %2761 = vmatprep.subr.bf16.mxu0 %v2916_v3 }
 0x5d9   : > { %p2881_p8 = pneg %p2880_p7 }
 0x5da   : > { %2751 = vmatmul.mubr.msk.f32.vlgmr.msra.gmra.mrb[18].mxu0 %vm717_vm3, %v1964_v17 }
 0x5db   : > { %2765 = vmatprep.mubr.msk.bf16.mxu0 %vm2917_vm1, %v2916_v3  ;;  %2762 = vmatpush3.bf16.msra.mxu0 %v2832_v9  ;;  %v2610_v9 = vld [vmem:[%s625_s0] ss:$0 sm:$0xff]  ;;  %p2888_p12 = pnand %p2887_p11, %p2881_p8 }
 0x5dc   : > { %2763 = vmatprep.subr.bf16.mxu0 %v2916_v3 }
 0x5df   : > { %2764 = vmatpush3.bf16.msra.mxu0 %v2833_v11 }
 0x668   : > { %v1047_v18 = vpop.f32.mrb[6].mxu0 }
 0x669   : > { %v2692_v19 = vpop.f32.mrb[7].mxu0 }
 0x66c   : > { %v1212_v20 = vpop.f32.mrb[8].mxu0 }
 0x66d   : > { %v2702_v21 = vpop.f32.mrb[9].mxu0 }
 0x69d   : > { %v1377_v22 = vpop.f32.mrb[10].mxu0 }
 0x69e   : > { %v2813_v23 = vpack.i.bf16 %v1377_v22, %v1212_v20  ;;  %v2712_v24 = vpop.f32.mrb[11].mxu0  ;;  %v2597_v22 = vld [vmem:[%s3371_s16] ss:$0 sm:$0xff] }
 0x6a0   : > { %2814 = vrot.lane.b32.xlu0 %v2813_v23, %s2929_s24 }
 0x6a1   : > { %v1542_v26 = vpop.f32.mrb[12].mxu0 }
 0x6a2   : > { %v2722_v27 = vpop.f32.mrb[13].mxu0 }
 0x6a3   : > { %v2598_v27 = vld [vmem:[%s3372_s23] ss:$0 sm:$0xff] }
 0x6a5   : > { %v1707_v29 = vpop.f32.mrb[14].mxu0 }
 0x6a6   : > { %v2818_v30 = vpack.i.bf16 %v1707_v29, %v1542_v26  ;;  %v2732_v31 = vpop.f32.mrb[15].mxu0 }
 0x6a8   : > { %2819 = vrot.lane.b32.xlu1 %v2818_v30, %s2930_s4 }
 0x6a9   : > { %v1872_v32 = vpop.f32.mrb[16].mxu0 }
 0x6aa   : > { %v2742_v33 = vpop.f32.mrb[17].mxu0 }
 0x6ab   : > { %v2837_v33 = vld [vmem:[%s3061_s28 + $0x18] sm:$0xff]  }
 0x6ad   : > { %v2037_v34 = vpop.f32.mrb[18].mxu0 }
 0x6ae   : > { %v2823_v35 = vpack.i.bf16 %v2037_v34, %v1872_v32  ;;  %v2752_v36 = vpop.f32.mrb[19].mxu0  ;;  %v2836_v32 = vld [vmem:[%s3061_s28 + $0x10] sm:$0xff]   ;;  %v2599_v34 = vld [vmem:[%s611_s2] ss:$0 sm:$0xff] }
 0x6b0   : > { %2824 = vrot.lane.b32.xlu0 %v2823_v35, %s2931_s22 }
 0x712   : > { %v2815_v37 = vpop.permute.xlu0 %2814 }
 0x713   : > { %v2817_v39 = vunpack.i.h.bf16 %v2815_v37  ;;  %v2816_v40 = vunpack.i.l.bf16 %v2815_v37 }
 0x715   : > { %v2066_v45 = vsel %vm717_vm3, %v1047_v18, %v2817_v39  ;;  %v2065_v46 = vsel %vm717_vm3, %v3180_v43, %v2816_v40 }
 0x71a   : > { %v2820_v38 = vpop.permute.xlu1 %2819 }
 0x71b   : > { %v2822_v41 = vunpack.i.h.bf16 %v2820_v38  ;;  %v2821_v42 = vunpack.i.l.bf16 %v2820_v38 }
 0x71d   : > { %v2069_v49 = vsel %vm2067_vm4, %v2066_v45, %v2822_v41  ;;  %v2068_v50 = vsel %vm2067_vm4, %v2065_v46, %v2821_v42 }
 0x722   : > { %v2825_v44 = vpop.permute.xlu0 %2824 }
 0x723   : > { %v2827_v47 = vunpack.i.h.bf16 %v2825_v44  ;;  %v2826_v48 = vunpack.i.l.bf16 %v2825_v44 }
 0x725   : > { %v2072_v51 = vsel %vm2070_vm5, %v2069_v49, %v2827_v47  ;;  %v2071_v52 = vsel %vm2070_vm5, %v2068_v50, %v2826_v48 }
 0x726   : > { %v2073_v53 = vpack.c.bf16 %v2072_v51, %v2071_v52 }
 0x728   : > { %2758 = vmatmul.mubr.msk.bf16.vlgmr.msra.gmra.mrb[16].mxu1 %vm662_vm2, %v2073_v53 }
 0x729   : > { %2777 = vmatprep.mubr.msk.bf16.mxu1 %vm2917_vm1, %v2916_v3  ;;  %2770 = vmatpush3.bf16.msra.mxu1 %v2834_v12 }
 0x72a   : > { %2771 = vmatprep.subr.bf16.mxu1 %v2916_v3 }
 0x72d   : > { %2772 = vmatpush3.bf16.msra.mxu1 %v2835_v13 }
 0x72e   : > { %2773 = vmatprep.subr.bf16.mxu1 %v2916_v3 }
 0x731   : > { %2774 = vmatpush3.bf16.msra.mxu1 %v2836_v32 }
 0x732   : > { %2775 = vmatprep.subr.bf16.mxu1 %v2916_v3  ;;  %v2603_v3 = vld [vmem:[%s619_s1] ss:$0 sm:$0xff] }
 0x735   : > { %2776 = vmatpush3.bf16.msra.mxu1 %v2837_v33 }
 0x7fb   : > { %v2134_v55 = vpop.f32.mrb[16].mxu1 }
 0x7fc   : > { %v2135_v56 = vadd.f32 %v2593_v54, %v2134_v55  ;;  %v2759_v43 = vpop.f32.mrb[17].mxu1 }
 0x7fd   : > { %v2137_v57 = vpop.f32.mrb[18].mxu1 }
 0x7fe   : > { %v2138_v58 = vadd.f32 %v2593_v54, %v2137_v57  ;;  %v2760_v59 = vpop.f32.mrb[19].mxu1  ;;  %v2141_v10 = vadd.f32 %v2135_v56, %v3086_v5 }
 0x800   : > { %v2143_v14 = vsel %vm662_vm2, %v2141_v10, 0.0  ;;  %v2142_v60 = vadd.f32 %v2138_v58, %v3088_v6 }
 0x801   : > { %2144 = vadd.xlane.f32.xlu1 %v2143_v14 }
 0x802   : > { %v2146_v61 = vsel %vm662_vm2, %v2142_v60, 0.0 }
 0x803   : > { %2147 = vadd.xlane.f32.xlu0 %v2146_v61 }
 0x88e   : > { %v2145_v62 = vpop.xlane.xlu1 %2144 }
 0x88f   : > { %v2150_v63 = vmul.f32 0.03125, %v2145_v62 }
 0x890   : > { %v2148_v0 = vpop.xlane.xlu0 %2147 }
 0x891   : > { %v2152_v1 = vsub.f32 %v2141_v10, %v2150_v63  ;;  %v2151_v2 = vmul.f32 0.03125, %v2148_v0 }
 0x893   : > { %v2153_v4 = vsub.f32 %v2142_v60, %v2151_v2  ;;  %v2154_v7 = vmul.f32 %v2152_v1, %v2152_v1 }
 0x895   : > { %v2156_v5 = vsel %vm662_vm2, %v2154_v7, 0.0  ;;  %v2155_v8 = vmul.f32 %v2153_v4, %v2153_v4 }
 0x896   : > { %2157 = vadd.xlane.f32.xlu0 %v2156_v5  ;;  %v2609_v5 = vld [vmem:[%s622_s19] ss:$0 sm:$0xff] }
 0x897   : > { %v2159_v6 = vsel %vm662_vm2, %v2155_v8, 0.0 }
 0x898   : > { %2160 = vadd.xlane.f32.xlu1 %v2159_v6 }
 0x923   : > { %v2158_v15 = vpop.xlane.xlu0 %2157 }
 0x924   : > { %v2162_v16 = vmul.f32 0.03125, %v2158_v15 }
 0x925   : > { %v2161_v17 = vpop.xlane.xlu1 %2160 }
 0x926   : > { %v2164_v18 = vadd.f32 1e-05, %v2162_v16  ;;  %v2163_v19 = vmul.f32 0.03125, %v2161_v17 }
 0x928   : > { %2870 = vrsqrt.f32 %v2164_v18  ;;  %v2165_v20 = vadd.f32 1e-05, %v2163_v19 }
 0x92a   : > { %2872 = vrsqrt.f32 %v2165_v20 }
 0x932   : > { %v2871_v21 = vpop.eup %2870 }
 0x933   : > { %v2168_v23 = vmul.f32 %v2871_v21, %v2152_v1 }
 0x934   : > { %v2873_v24 = vpop.eup %2872 }
 0x935   : > { %v2177_v25 = vmul.f32 %v2597_v22, %v2168_v23  ;;  %v2169_v26 = vmul.f32 %v2873_v24, %v2153_v4 }
 0x937   : > { %v2178_v28 = vmul.f32 %v2597_v22, %v2169_v26  ;;  %v2186_v29 = vadd.f32 %v2598_v27, %v2177_v25 }
 0x939   : > { %v2187_v30 = vadd.f32 %v2598_v27, %v2178_v28 }
 0x93b   : > { %v2188_v31 = vpack.c.bf16 %v2187_v30, %v2186_v29 }
 0x93d   : > { %2766 = vmatmul.mubr.msk.bf16.vlgmr.msra.gmra.mrb[20].mxu0 %vm662_vm2, %v2188_v31 }
 0xa10   : > { %v2249_v35 = vpop.f32.mrb[20].mxu0 }
 0xa11   : > { %v2250_v36 = vadd.f32 %v2599_v34, %v2249_v35  ;;  %v2767_v37 = vpop.f32.mrb[21].mxu0 }
 0xa12   : > { %v2252_v38 = vpop.f32.mrb[22].mxu0 }
 0xa13   : > { %v2253_v39 = vadd.f32 %v2599_v34, %v2252_v38  ;;  %v2768_v40 = vpop.f32.mrb[23].mxu0  ;;  %v2256_v41 = vmax.f32 %v2250_v36, 0.0 }
 0xa15   : > { %v2257_v42 = vmax.f32 %v2253_v39, 0.0 }
 0xa17   : > { %v2258_v44 = vpack.c.bf16 %v2257_v42, %v2256_v41 }
 0xa19   : > { %2778 = vmatmul.mubr.msk.bf16.vlgmr.msra.gmra.mrb[20].mxu1 %vm2298_vm6, %v2258_v44 }
 0xaec   : > { %v2336_v45 = vpop.f32.mrb[20].mxu1 }
 0xaed   : > { %v2337_v46 = vadd.f32 %v2603_v3, %v2336_v45  ;;  %v2779_v47 = vpop.f32.mrb[21].mxu1 }
 0xaee   : > { %v2339_v48 = vpop.f32.mrb[22].mxu1 }
 0xaef   : > { %v2340_v49 = vadd.f32 %v2603_v3, %v2339_v48  ;;  %v2780_v50 = vpop.f32.mrb[23].mxu1  ;;  %v2343_v51 = vadd.f32 %v2337_v46, %v2186_v29 }
 0xaf1   : > { %v2345_v52 = vsel %vm662_vm2, %v2343_v51, 0.0  ;;  %v2344_v53 = vadd.f32 %v2340_v49, %v2187_v30 }
 0xaf2   : > { %2346 = vadd.xlane.f32.xlu0 %v2345_v52 }
 0xaf3   : > { %v2348_v54 = vsel %vm662_vm2, %v2344_v53, 0.0 }
 0xaf4   : > { %2349 = vadd.xlane.f32.xlu1 %v2348_v54 }
 0xb7f   : > { %v2347_v55 = vpop.xlane.xlu0 %2346 }
 0xb80   : > { %v2351_v56 = vmul.f32 0.03125, %v2347_v55 }
 0xb81   : > { %v2350_v43 = vpop.xlane.xlu1 %2349 }
 0xb82   : > { %v2353_v57 = vsub.f32 %v2343_v51, %v2351_v56  ;;  %v2352_v58 = vmul.f32 0.03125, %v2350_v43 }
 0xb84   : > { %v2354_v59 = vsub.f32 %v2344_v53, %v2352_v58  ;;  %v2355_v10 = vmul.f32 %v2353_v57, %v2353_v57 }
 0xb86   : > { %v2357_v14 = vsel %vm662_vm2, %v2355_v10, 0.0  ;;  %v2356_v60 = vmul.f32 %v2354_v59, %v2354_v59 }
 0xb87   : > { %2358 = vadd.xlane.f32.xlu0 %v2357_v14 }
 0xb88   : > { %v2360_v61 = vsel %vm662_vm2, %v2356_v60, 0.0 }
 0xb89   : > { %2361 = vadd.xlane.f32.xlu1 %v2360_v61 }
 0xc14   : > { %v2359_v62 = vpop.xlane.xlu0 %2358 }
 0xc15   : > { %v2363_v63 = vmul.f32 0.03125, %v2359_v62 }
 0xc16   : > { %v2362_v0 = vpop.xlane.xlu1 %2361 }
 0xc17   : > { %v2365_v1 = vadd.f32 1e-05, %v2363_v63  ;;  %v2364_v2 = vmul.f32 0.03125, %v2362_v0 }
 0xc19   : > { %2874 = vrsqrt.f32 %v2365_v1  ;;  %v2366_v4 = vadd.f32 1e-05, %v2364_v2 }
 0xc1b   : > { %2876 = vrsqrt.f32 %v2366_v4 }
 0xc23   : > { %v2875_v7 = vpop.eup %2874 }
 0xc24   : > { %v2369_v8 = vmul.f32 %v2875_v7, %v2353_v57 }
 0xc25   : > { %v2877_v6 = vpop.eup %2876 }
 0xc26   : > { %v2370_v11 = vmul.f32 %v2877_v6, %v2354_v59  ;;  %v2378_v12 = vmul.f32 %v2609_v5, %v2369_v8 }
 0xc28   : > { %v2379_v13 = vmul.f32 %v2609_v5, %v2370_v11  ;;  %v2387_v15 = vadd.f32 %v2610_v9, %v2378_v12 }
 0xc2a   : > { %v2388_v16 = vadd.f32 %v2610_v9, %v2379_v13  ;;  %2389 = vst.msk [vmem:[#allocation2] sm:$0xff] %vm662_vm2, %v2387_v15  ;;  %2391 = vst.msk [vmem:[#allocation3] sm:$0xff] %vm662_vm2, %v2387_v15 }
 0xc2c   : > { %2390 = vst.msk [vmem:[#allocation2 + $0x8] sm:$0xff] %vm662_vm2, %v2388_v16  ;;  %2392 = vst.msk [vmem:[#allocation3 + $0x8] sm:$0xff] %vm662_vm2, %v2388_v16 }
 0xc2d   : > { %2891 = shalt.err (!%p2888_p12)
}
 0xc2e   : > { %s3373_s16 = sld [smem:[#allocation11_spill]] }
 0xc34   : > { %s2892_s20 = scalar_lea.hbm %s3373_s16, 256 }
 0xc35   : > { %p2893_p13 = scmp.ne.s32.totalorder %s3373_s16, %s2892_s20  ;;  %p2898_p2 = scmp.lt.u32.totalorder %s2892_s20, %s3373_s16 }
 0xc37   : > { %p2894_p0 = pnand %p2893_p13, %p2785_p5 }
 0xc39   : > { %p2895_p1 = pneg %p2894_p0 }
 0xc3b   : > { %p2900_p3 = pnand %p2898_p2, %p2895_p1 }
 0xc3d   : > { %2903 = shalt.err (!%p2900_p3)
}
 0xc3e   : > { %s2933_s25 = smov 128  }
 0xc3f   : > { %2782 = dma.vmem_to_hbm [thread:$0]  (%p2785_p5), %s2400_s17, 256, %s3373_s16, [#allocation4], %s2933_s25, %s2933_s25, %s2929_s24  }
 0xc40   : > { %2909 = dma.done.wait (%p2785_p5), [#allocation4], 256  }
 0xc41   : > { %2911 = vsyncadd (%p2785_p5), [#allocation4], 4294967040 }
 0xc42 PF: > { %s3374_s28 = sld [smem:[#allocation6_spill]] }
 0xc48   : > { %s25_s29 = sadd.s32 1, %s3374_s28  }
 0xc49   : > { %p22_p4 = scmp.ge.s32.totalorder %s25_s29, 4  }
 0xc4b   :  { %24 = sbr.rel (!%p22_p4) target bundleno = 7 (0x7), region = 141 }
 0xc52   :  { %2415 = vsyncpa [#allocation4], 1 }
 0xc53   :  { %2417 = vsyncpa [#allocation4 + $0x1], 1 }

</bundles_post_ra>
